<compile_context>
chip_gen: v5e
topology: v5e:2x2
jax: 0.10.0
libtpu: 0.0.40
codegen_flags: <defaults>
</compile_context>

<pallas_src>
import functools

import jax
import jax.numpy as jnp
from jax.experimental import pallas as pl
from jax.experimental.pallas import tpu as pltpu


# ----------------------------------------------------------------------------
# ConvTranspose2d(k=3, stride=2, padding=1, output_padding=1) phase layout:
# output pixel (2m+py, 2n+px) receives taps (ky,kx) listed below, reading
# d[m+dy, n+dx] (zero outside).  k = 3*ky + kx.
# ----------------------------------------------------------------------------
_PHASE_TAPS = {}
for _ky in range(3):
    for _kx in range(3):
        _py, _dy = (0, 0) if _ky == 1 else ((1, 1) if _ky == 0 else (1, 0))
        _px, _dx = (0, 0) if _kx == 1 else ((1, 1) if _kx == 0 else (1, 0))
        _PHASE_TAPS.setdefault((_py, _px), []).append((3 * _ky + _kx, _dy, _dx))


# ----------------------------------------------------------------------------
# Fused Pallas kernel: down3 + (cat + up) + skip + FC + sigmoid, per batch elem
# ----------------------------------------------------------------------------
def _prm_kernel(patches_ref, xph_ref, cmask_ref, wd_ref, bt_ref, a_ref, b_ref,
                o_ref, dflat, *, Ho, Wo):
    M = Ho * Wo

    # down3: one K-fused matmul  (M, 9*C) @ (9*C, Cd)
    d = jnp.dot(patches_ref[0, :, :], wd_ref[...],
                preferred_element_type=jnp.float32)

    # Row-flattened, zero-padded copy of d kept in VMEM so the 4 transposed-conv
    # phases below can read shifted windows with static slices.
    dflat[...] = jnp.zeros_like(dflat)
    dflat[0:M, :] = d

    cmask = cmask_ref[...]   # (M, 1): zero where a +1 column shift would wrap
    bias = b_ref[...]        # (1, P)

    for py in range(2):
        for px in range(2):
            q = 2 * py + px
            # skip conv + first half of FC, folded into one matmul
            acc = jnp.dot(xph_ref[0, q, :, :], a_ref[...],
                          preferred_element_type=jnp.float32)
            # transposed-conv taps of this phase, second half of FC folded in
            for (k, dy, dx) in _PHASE_TAPS[(py, px)]:
                off = dy * Wo + dx
                sh = dflat[off:off + M, :]
                if dx == 1:
                    sh = sh * cmask
                acc = acc + jnp.dot(sh, bt_ref[k, :, :],
                                    preferred_element_type=jnp.float32)
            z = acc + bias
            o_ref[0, q, :, :] = 1.0 / (1.0 + jnp.exp(-z))


# ----------------------------------------------------------------------------
# Forward wrapper (NCHW in / NCHW out, matching the PyTorch module)
# ----------------------------------------------------------------------------
def prm_forward(x_nchw, params):
    N, C, H, W = x_nchw.shape
    assert H % 2 == 0 and W % 2 == 0, "kernel assumes even spatial dims"

    w_down = params["w_down"]   # (Cd, C, 3, 3)    OIHW           (down3, no bias)
    w_up = params["w_up"]       # (3*Cd, Cd, 3, 3) torch (in,out,kh,kw)
    b_up = params["b_up"]       # (Cd,)
    w_skip = params["w_skip"]   # (C, Cd)          1x1 conv as matrix
    b_skip = params["b_skip"]   # (Cd,)
    w_fc = params["w_fc"]       # (2*Cd, P)        1x1 conv as matrix, no bias

    Cd = w_down.shape[0]
    P = w_fc.shape[1]
    Ho, Wo = H // 2, W // 2
    M = Ho * Wo

    x_nhwc = jnp.transpose(x_nchw, (0, 2, 3, 1))

    # --- JAX glue: K-fused im2col for the dilated (3) strided (2) down3 conv ---
    xp = jnp.pad(x_nhwc, ((0, 0), (3, 3), (3, 3), (0, 0)))
    taps = [xp[:, 3 * ky:3 * ky + 2 * Ho:2, 3 * kx:3 * kx + 2 * Wo:2, :]
            for ky in range(3) for kx in range(3)]
    patches = jnp.concatenate(taps, axis=-1).reshape(N, M, 9 * C)

    # --- phase-split view of x for the skip/FC path (phase q = 2*py+px) ---
    xph = (x_nhwc.reshape(N, Ho, 2, Wo, 2, C)
           .transpose(0, 2, 4, 1, 3, 5)
           .reshape(N, 4, M, C))

    # column mask: zero rows where a +1 column shift of row-flattened d wraps
    cmask = ((jnp.arange(M, dtype=jnp.int32) % Wo) != (Wo - 1)
             ).astype(jnp.float32).reshape(M, 1)

    # --- fold weights (exact linear algebra, tiny) ---
    wd_mat = jnp.transpose(w_down, (2, 3, 1, 0)).reshape(9 * C, Cd)
    w_up_s = w_up.reshape(3, Cd, Cd, 3, 3).sum(axis=0)      # cat([d,d,d]) -> sum groups
    wfc_s, wfc_u = w_fc[:Cd], w_fc[Cd:]
    a_mat = w_skip @ wfc_s                                   # (C, P)  skip∘FC
    b_taps = jnp.stack([w_up_s[:, :, ky, kx] @ wfc_u         # (9, Cd, P)  up-tap∘FC
                        for ky in range(3) for kx in range(3)], axis=0)
    bias = (b_skip @ wfc_s + b_up @ wfc_u).reshape(1, P)

    kernel = functools.partial(_prm_kernel, Ho=Ho, Wo=Wo)
    out_ph = pl.pallas_call(
        kernel,
        out_shape=jax.ShapeDtypeStruct((N, 4, M, P), jnp.float32),
        grid=(N,),
        in_specs=[
            pl.BlockSpec((1, M, 9 * C), lambda n: (n, 0, 0)),
            pl.BlockSpec((1, 4, M, C), lambda n: (n, 0, 0, 0)),
            pl.BlockSpec((M, 1), lambda n: (0, 0)),
            pl.BlockSpec((9 * C, Cd), lambda n: (0, 0)),
            pl.BlockSpec((9, Cd, P), lambda n: (0, 0, 0)),
            pl.BlockSpec((C, P), lambda n: (0, 0)),
            pl.BlockSpec((1, P), lambda n: (0, 0)),
        ],
        out_specs=pl.BlockSpec((1, 4, M, P), lambda n: (n, 0, 0, 0)),
        scratch_shapes=[pltpu.VMEM((M + Wo + 8, Cd), jnp.float32)],
        compiler_params=pltpu.CompilerParams(
            dimension_semantics=("parallel",)),
    )(patches, xph, cmask, wd_mat, b_taps, a_mat, bias)

    # interleave the 4 output phases back to (N, H, W, P), then to NCHW
    out = (out_ph.reshape(N, 2, 2, Ho, Wo, P)
           .transpose(0, 3, 1, 4, 2, 5)
           .reshape(N, H, W, P))
    return jnp.transpose(out, (0, 3, 1, 2))


# ----------------------------------------------------------------------------
# Pure-JAX reference (independent formulation, HIGHEST precision)
# ----------------------------------------------------------------------------
def ref_forward(x, params):
    HI = jax.lax.Precision.HIGHEST
    dn = jax.lax.conv_general_dilated(
        x, params["w_down"], window_strides=(2, 2), padding=((3, 3), (3, 3)),
        rhs_dilation=(3, 3), dimension_numbers=("NCHW", "OIHW", "NCHW"),
        precision=HI)
    xdown = jnp.concatenate([dn, dn, dn], axis=1)
    # ConvTranspose2d(k=3, s=2, p=1, output_padding=1) as a dilated conv with
    # the spatially-flipped, (in,out)-transposed kernel.
    w_t = jnp.transpose(jnp.flip(params["w_up"], axis=(2, 3)), (1, 0, 2, 3))
    up = jax.lax.conv_general_dilated(
        xdown, w_t, window_strides=(1, 1), padding=((1, 2), (1, 2)),
        lhs_dilation=(2, 2), dimension_numbers=("NCHW", "OIHW", "NCHW"),
        precision=HI)
    up = up + params["b_up"][None, :, None, None]
    skip = (jnp.einsum("nchw,co->nohw", x, params["w_skip"], precision=HI)
            + params["b_skip"][None, :, None, None])
    cat = jnp.concatenate([skip, up], axis=1)
    out = jnp.einsum("nchw,co->nohw", cat, params["w_fc"], precision=HI)
    return jax.nn.sigmoid(out)


# ----------------------------------------------------------------------------
# Main
# ----------------------------------------------------------------------------
if __name__ == "__main__":
    channel, part_num = 32, 7
    N, H, W = 2, 16, 16
    Cd = channel // 4

    key = jax.random.PRNGKey(0)
    ks = jax.random.split(key, 8)

    x = jax.random.normal(ks[0], (N, channel, H, W), jnp.float32)
    params = {
        "w_down": 0.1 * jax.random.normal(ks[1], (Cd, channel, 3, 3), jnp.float32),
        "w_up": 0.1 * jax.random.normal(ks[2], (3 * Cd, Cd, 3, 3), jnp.float32),
        "b_up": 0.1 * jax.random.normal(ks[3], (Cd,), jnp.float32),
        "w_skip": 0.1 * jax.random.normal(ks[4], (channel, Cd), jnp.float32),
        "b_skip": 0.1 * jax.random.normal(ks[5], (Cd,), jnp.float32),
        "w_fc": 0.1 * jax.random.normal(ks[6], (channel // 2, part_num), jnp.float32),
    }

    fwd = jax.jit(prm_forward)
    out = fwd(x, params)
    jax.block_until_ready(out)

    ref = jax.jit(ref_forward)(x, params)
    assert out.shape == (N, part_num, H, W)
    max_err = float(jnp.max(jnp.abs(out - ref)))
    assert jnp.allclose(out, ref, atol=3e-3, rtol=3e-3), f"max_err={max_err}"

    print("KERNEL_OK")
</pallas_src>

<mosaic_0001>
module attributes {stable_mosaic.version = 11 : i64} {
  func.func @_prm_kernel(%arg0: i32, %arg1: memref<1x64x288xf32, #tpu.memory_space<vmem>>, %arg2: memref<1x4x64x32xf32, #tpu.memory_space<vmem>>, %arg3: memref<64x1xf32, #tpu.memory_space<vmem>>, %arg4: memref<288x8xf32, #tpu.memory_space<vmem>>, %arg5: memref<9x8x7xf32, #tpu.memory_space<vmem>>, %arg6: memref<32x7xf32, #tpu.memory_space<vmem>>, %arg7: memref<1x7xf32, #tpu.memory_space<vmem>>, %arg8: memref<1x4x64x7xf32, #tpu.memory_space<vmem>>, %arg9: memref<80x8xf32, #tpu.memory_space<vmem>>) attributes {dimension_semantics = [#tpu.dimension_semantics<parallel>], iteration_bounds = array<i64: 2>, scalar_prefetch = 0 : i64, scratch_operands = 1 : i64, tpu.core_type = #tpu.core_type<tc>, window_params = [{transform_indices = @transform_0, window_bounds = array<i64: 1, 64, 288>}, {transform_indices = @transform_1, window_bounds = array<i64: 1, 4, 64, 32>}, {pipeline_mode = #tpu.pipeline_mode<synchronous>, transform_indices = @transform_2, window_bounds = array<i64: 64, 1>}, {pipeline_mode = #tpu.pipeline_mode<synchronous>, transform_indices = @transform_3, window_bounds = array<i64: 288, 8>}, {pipeline_mode = #tpu.pipeline_mode<synchronous>, transform_indices = @transform_4, window_bounds = array<i64: 9, 8, 7>}, {pipeline_mode = #tpu.pipeline_mode<synchronous>, transform_indices = @transform_5, window_bounds = array<i64: 32, 7>}, {pipeline_mode = #tpu.pipeline_mode<synchronous>, transform_indices = @transform_6, window_bounds = array<i64: 1, 7>}, {transform_indices = @transform_7, window_bounds = array<i64: 1, 4, 64, 7>}]} {
    %c0 = arith.constant 0 : index
    %c0_0 = arith.constant 0 : index
    %c0_1 = arith.constant 0 : index
    %0 = vector.load %arg1[%c0, %c0_0, %c0_1] : memref<1x64x288xf32, #tpu.memory_space<vmem>>, vector<1x64x288xf32>
    %1 = vector.shape_cast %0 : vector<1x64x288xf32> to vector<64x288xf32>
    %c0_2 = arith.constant 0 : index
    %c0_3 = arith.constant 0 : index
    %2 = vector.load %arg4[%c0_2, %c0_3] : memref<288x8xf32, #tpu.memory_space<vmem>>, vector<288x8xf32>
    %cst = arith.constant dense<0.000000e+00> : vector<64x8xf32>
    %3 = tpu.matmul %1, %2, %cst {dimension_numbers = #tpu.dot_dimension_numbers<[1], [0], [0], [1], [0, 0, 1, 1], [], []>} : vector<64x288xf32>, vector<288x8xf32>, vector<64x8xf32> -> vector<64x8xf32>
    %cst_4 = arith.constant 0.000000e+00 : f32
    %4 = vector.broadcast %cst_4 : f32 to vector<80x8xf32>
    %c0_5 = arith.constant 0 : index
    %c0_6 = arith.constant 0 : index
    %5 = vector.load %arg9[%c0_5, %c0_6] : memref<80x8xf32, #tpu.memory_space<vmem>>, vector<80x8xf32>
    tpu.vector_store %arg9[%c0_5, %c0_6], %4 {strides = array<i32>} : memref<80x8xf32, #tpu.memory_space<vmem>>, vector<80x8xf32>,
    %c0_7 = arith.constant 0 : index
    %c0_8 = arith.constant 0 : index
    %6 = vector.load %arg9[%c0_7, %c0_8] : memref<80x8xf32, #tpu.memory_space<vmem>>, vector<64x8xf32>
    tpu.vector_store %arg9[%c0_7, %c0_8], %3 {strides = array<i32>} : memref<80x8xf32, #tpu.memory_space<vmem>>, vector<64x8xf32>,
    %c0_9 = arith.constant 0 : index
    %c0_10 = arith.constant 0 : index
    %7 = vector.load %arg3[%c0_9, %c0_10] : memref<64x1xf32, #tpu.memory_space<vmem>>, vector<64x1xf32>
    %c0_11 = arith.constant 0 : index
    %c0_12 = arith.constant 0 : index
    %8 = vector.load %arg7[%c0_11, %c0_12] : memref<1x7xf32, #tpu.memory_space<vmem>>, vector<1x7xf32>
    %c0_13 = arith.constant 0 : index
    %c0_14 = arith.constant 0 : index
    %c0_15 = arith.constant 0 : index
    %c0_16 = arith.constant 0 : index
    %9 = vector.load %arg2[%c0_13, %c0_14, %c0_15, %c0_16] : memref<1x4x64x32xf32, #tpu.memory_space<vmem>>, vector<1x1x64x32xf32>
    %10 = vector.shape_cast %9 : vector<1x1x64x32xf32> to vector<64x32xf32>
    %c0_17 = arith.constant 0 : index
    %c0_18 = arith.constant 0 : index
    %11 = vector.load %arg6[%c0_17, %c0_18] : memref<32x7xf32, #tpu.memory_space<vmem>>, vector<32x7xf32>
    %cst_19 = arith.constant dense<0.000000e+00> : vector<64x7xf32>
    %12 = tpu.matmul %10, %11, %cst_19 {dimension_numbers = #tpu.dot_dimension_numbers<[1], [0], [0], [1], [0, 0, 1, 1], [], []>} : vector<64x32xf32>, vector<32x7xf32>, vector<64x7xf32> -> vector<64x7xf32>
    %c0_20 = arith.constant 0 : index
    %c0_21 = arith.constant 0 : index
    %13 = vector.load %arg9[%c0_20, %c0_21] : memref<80x8xf32, #tpu.memory_space<vmem>>, vector<64x8xf32>
    %c4 = arith.constant 4 : index
    %c0_22 = arith.constant 0 : index
    %c0_23 = arith.constant 0 : index
    %14 = vector.load %arg5[%c4, %c0_22, %c0_23] : memref<9x8x7xf32, #tpu.memory_space<vmem>>, vector<1x8x7xf32>
    %15 = vector.shape_cast %14 : vector<1x8x7xf32> to vector<8x7xf32>
    %cst_24 = arith.constant dense<0.000000e+00> : vector<64x7xf32>
    %16 = tpu.matmul %13, %15, %cst_24 {dimension_numbers = #tpu.dot_dimension_numbers<[1], [0], [0], [1], [0, 0, 1, 1], [], []>} : vector<64x8xf32>, vector<8x7xf32>, vector<64x7xf32> -> vector<64x7xf32>
    %17 = arith.addf %12, %16 : vector<64x7xf32>
    %18 = vector.broadcast %8 : vector<1x7xf32> to vector<64x7xf32>
    %19 = arith.addf %17, %18 : vector<64x7xf32>
    %cst_25 = arith.constant 0.000000e+00 : f32
    %20 = vector.broadcast %cst_25 : f32 to vector<64x7xf32>
    %21 = arith.subf %20, %19 : vector<64x7xf32>
    %22 = math.exp %21 : vector<64x7xf32>
    %cst_26 = arith.constant 1.000000e+00 : f32
    %23 = vector.broadcast %cst_26 : f32 to vector<64x7xf32>
    %24 = arith.addf %23, %22 : vector<64x7xf32>
    %cst_27 = arith.constant 1.000000e+00 : f32
    %25 = vector.broadcast %cst_27 : f32 to vector<64x7xf32>
    %26 = arith.divf %25, %24 : vector<64x7xf32>
    %c0_28 = arith.constant 0 : index
    %c0_29 = arith.constant 0 : index
    %c0_30 = arith.constant 0 : index
    %c0_31 = arith.constant 0 : index
    %27 = vector.load %arg8[%c0_28, %c0_29, %c0_30, %c0_31] : memref<1x4x64x7xf32, #tpu.memory_space<vmem>>, vector<1x1x64x7xf32>
    %28 = vector.shape_cast %27 : vector<1x1x64x7xf32> to vector<64x7xf32>
    %29 = vector.shape_cast %26 : vector<64x7xf32> to vector<1x1x64x7xf32>
    tpu.vector_store %arg8[%c0_28, %c0_29, %c0_30, %c0_31], %29 {strides = array<i32>} : memref<1x4x64x7xf32, #tpu.memory_space<vmem>>, vector<1x1x64x7xf32>,
    %c0_32 = arith.constant 0 : index
    %c1 = arith.constant 1 : index
    %c0_33 = arith.constant 0 : index
    %c0_34 = arith.constant 0 : index
    %30 = vector.load %arg2[%c0_32, %c1, %c0_33, %c0_34] : memref<1x4x64x32xf32, #tpu.memory_space<vmem>>, vector<1x1x64x32xf32>
    %31 = vector.shape_cast %30 : vector<1x1x64x32xf32> to vector<64x32xf32>
    %c0_35 = arith.constant 0 : index
    %c0_36 = arith.constant 0 : index
    %32 = vector.load %arg6[%c0_35, %c0_36] : memref<32x7xf32, #tpu.memory_space<vmem>>, vector<32x7xf32>
    %cst_37 = arith.constant dense<0.000000e+00> : vector<64x7xf32>
    %33 = tpu.matmul %31, %32, %cst_37 {dimension_numbers = #tpu.dot_dimension_numbers<[1], [0], [0], [1], [0, 0, 1, 1], [], []>} : vector<64x32xf32>, vector<32x7xf32>, vector<64x7xf32> -> vector<64x7xf32>
    %c1_38 = arith.constant 1 : index
    %c0_39 = arith.constant 0 : index
    %34 = vector.load %arg9[%c1_38, %c0_39] : memref<80x8xf32, #tpu.memory_space<vmem>>, vector<64x8xf32>
    %35 = vector.broadcast %7 : vector<64x1xf32> to vector<64x8xf32>
    %36 = arith.mulf %34, %35 : vector<64x8xf32>
    %c3 = arith.constant 3 : index
    %c0_40 = arith.constant 0 : index
    %c0_41 = arith.constant 0 : index
    %37 = vector.load %arg5[%c3, %c0_40, %c0_41] : memref<9x8x7xf32, #tpu.memory_space<vmem>>, vector<1x8x7xf32>
    %38 = vector.shape_cast %37 : vector<1x8x7xf32> to vector<8x7xf32>
    %cst_42 = arith.constant dense<0.000000e+00> : vector<64x7xf32>
    %39 = tpu.matmul %36, %38, %cst_42 {dimension_numbers = #tpu.dot_dimension_numbers<[1], [0], [0], [1], [0, 0, 1, 1], [], []>} : vector<64x8xf32>, vector<8x7xf32>, vector<64x7xf32> -> vector<64x7xf32>
    %40 = arith.addf %33, %39 : vector<64x7xf32>
    %c0_43 = arith.constant 0 : index
    %c0_44 = arith.constant 0 : index
    %41 = vector.load %arg9[%c0_43, %c0_44] : memref<80x8xf32, #tpu.memory_space<vmem>>, vector<64x8xf32>
    %c5 = arith.constant 5 : index
    %c0_45 = arith.constant 0 : index
    %c0_46 = arith.constant 0 : index
    %42 = vector.load %arg5[%c5, %c0_45, %c0_46] : memref<9x8x7xf32, #tpu.memory_space<vmem>>, vector<1x8x7xf32>
    %43 = vector.shape_cast %42 : vector<1x8x7xf32> to vector<8x7xf32>
    %cst_47 = arith.constant dense<0.000000e+00> : vector<64x7xf32>
    %44 = tpu.matmul %41, %43, %cst_47 {dimension_numbers = #tpu.dot_dimension_numbers<[1], [0], [0], [1], [0, 0, 1, 1], [], []>} : vector<64x8xf32>, vector<8x7xf32>, vector<64x7xf32> -> vector<64x7xf32>
    %45 = arith.addf %40, %44 : vector<64x7xf32>
    %46 = vector.broadcast %8 : vector<1x7xf32> to vector<64x7xf32>
    %47 = arith.addf %45, %46 : vector<64x7xf32>
    %cst_48 = arith.constant 0.000000e+00 : f32
    %48 = vector.broadcast %cst_48 : f32 to vector<64x7xf32>
    %49 = arith.subf %48, %47 : vector<64x7xf32>
    %50 = math.exp %49 : vector<64x7xf32>
    %cst_49 = arith.constant 1.000000e+00 : f32
    %51 = vector.broadcast %cst_49 : f32 to vector<64x7xf32>
    %52 = arith.addf %51, %50 : vector<64x7xf32>
    %cst_50 = arith.constant 1.000000e+00 : f32
    %53 = vector.broadcast %cst_50 : f32 to vector<64x7xf32>
    %54 = arith.divf %53, %52 : vector<64x7xf32>
    %c0_51 = arith.constant 0 : index
    %c1_52 = arith.constant 1 : index
    %c0_53 = arith.constant 0 : index
    %c0_54 = arith.constant 0 : index
    %55 = vector.load %arg8[%c0_51, %c1_52, %c0_53, %c0_54] : memref<1x4x64x7xf32, #tpu.memory_space<vmem>>, vector<1x1x64x7xf32>
    %56 = vector.shape_cast %55 : vector<1x1x64x7xf32> to vector<64x7xf32>
    %57 = vector.shape_cast %54 : vector<64x7xf32> to vector<1x1x64x7xf32>
    tpu.vector_store %arg8[%c0_51, %c1_52, %c0_53, %c0_54], %57 {strides = array<i32>} : memref<1x4x64x7xf32, #tpu.memory_space<vmem>>, vector<1x1x64x7xf32>,
    %c0_55 = arith.constant 0 : index
    %c2 = arith.constant 2 : index
    %c0_56 = arith.constant 0 : index
    %c0_57 = arith.constant 0 : index
    %58 = vector.load %arg2[%c0_55, %c2, %c0_56, %c0_57] : memref<1x4x64x32xf32, #tpu.memory_space<vmem>>, vector<1x1x64x32xf32>
    %59 = vector.shape_cast %58 : vector<1x1x64x32xf32> to vector<64x32xf32>
    %c0_58 = arith.constant 0 : index
    %c0_59 = arith.constant 0 : index
    %60 = vector.load %arg6[%c0_58, %c0_59] : memref<32x7xf32, #tpu.memory_space<vmem>>, vector<32x7xf32>
    %cst_60 = arith.constant dense<0.000000e+00> : vector<64x7xf32>
    %61 = tpu.matmul %59, %60, %cst_60 {dimension_numbers = #tpu.dot_dimension_numbers<[1], [0], [0], [1], [0, 0, 1, 1], [], []>} : vector<64x32xf32>, vector<32x7xf32>, vector<64x7xf32> -> vector<64x7xf32>
    %c8 = arith.constant 8 : index
    %c0_61 = arith.constant 0 : index
    %62 = vector.load %arg9[%c8, %c0_61] : memref<80x8xf32, #tpu.memory_space<vmem>>, vector<64x8xf32>
    %c1_62 = arith.constant 1 : index
    %c0_63 = arith.constant 0 : index
    %c0_64 = arith.constant 0 : index
    %63 = vector.load %arg5[%c1_62, %c0_63, %c0_64] : memref<9x8x7xf32, #tpu.memory_space<vmem>>, vector<1x8x7xf32>
    %64 = vector.shape_cast %63 : vector<1x8x7xf32> to vector<8x7xf32>
    %cst_65 = arith.constant dense<0.000000e+00> : vector<64x7xf32>
    %65 = tpu.matmul %62, %64, %cst_65 {dimension_numbers = #tpu.dot_dimension_numbers<[1], [0], [0], [1], [0, 0, 1, 1], [], []>} : vector<64x8xf32>, vector<8x7xf32>, vector<64x7xf32> -> vector<64x7xf32>
    %66 = arith.addf %61, %65 : vector<64x7xf32>
    %c0_66 = arith.constant 0 : index
    %c0_67 = arith.constant 0 : index
    %67 = vector.load %arg9[%c0_66, %c0_67] : memref<80x8xf32, #tpu.memory_space<vmem>>, vector<64x8xf32>
    %c7 = arith.constant 7 : index
    %c0_68 = arith.constant 0 : index
    %c0_69 = arith.constant 0 : index
    %68 = vector.load %arg5[%c7, %c0_68, %c0_69] : memref<9x8x7xf32, #tpu.memory_space<vmem>>, vector<1x8x7xf32>
    %69 = vector.shape_cast %68 : vector<1x8x7xf32> to vector<8x7xf32>
    %cst_70 = arith.constant dense<0.000000e+00> : vector<64x7xf32>
    %70 = tpu.matmul %67, %69, %cst_70 {dimension_numbers = #tpu.dot_dimension_numbers<[1], [0], [0], [1], [0, 0, 1, 1], [], []>} : vector<64x8xf32>, vector<8x7xf32>, vector<64x7xf32> -> vector<64x7xf32>
    %71 = arith.addf %66, %70 : vector<64x7xf32>
    %72 = vector.broadcast %8 : vector<1x7xf32> to vector<64x7xf32>
    %73 = arith.addf %71, %72 : vector<64x7xf32>
    %cst_71 = arith.constant 0.000000e+00 : f32
    %74 = vector.broadcast %cst_71 : f32 to vector<64x7xf32>
    %75 = arith.subf %74, %73 : vector<64x7xf32>
    %76 = math.exp %75 : vector<64x7xf32>
    %cst_72 = arith.constant 1.000000e+00 : f32
    %77 = vector.broadcast %cst_72 : f32 to vector<64x7xf32>
    %78 = arith.addf %77, %76 : vector<64x7xf32>
    %cst_73 = arith.constant 1.000000e+00 : f32
    %79 = vector.broadcast %cst_73 : f32 to vector<64x7xf32>
    %80 = arith.divf %79, %78 : vector<64x7xf32>
    %c0_74 = arith.constant 0 : index
    %c2_75 = arith.constant 2 : index
    %c0_76 = arith.constant 0 : index
    %c0_77 = arith.constant 0 : index
    %81 = vector.load %arg8[%c0_74, %c2_75, %c0_76, %c0_77] : memref<1x4x64x7xf32, #tpu.memory_space<vmem>>, vector<1x1x64x7xf32>
    %82 = vector.shape_cast %81 : vector<1x1x64x7xf32> to vector<64x7xf32>
    %83 = vector.shape_cast %80 : vector<64x7xf32> to vector<1x1x64x7xf32>
    tpu.vector_store %arg8[%c0_74, %c2_75, %c0_76, %c0_77], %83 {strides = array<i32>} : memref<1x4x64x7xf32, #tpu.memory_space<vmem>>, vector<1x1x64x7xf32>,
    %c0_78 = arith.constant 0 : index
    %c3_79 = arith.constant 3 : index
    %c0_80 = arith.constant 0 : index
    %c0_81 = arith.constant 0 : index
    %84 = vector.load %arg2[%c0_78, %c3_79, %c0_80, %c0_81] : memref<1x4x64x32xf32, #tpu.memory_space<vmem>>, vector<1x1x64x32xf32>
    %85 = vector.shape_cast %84 : vector<1x1x64x32xf32> to vector<64x32xf32>
    %c0_82 = arith.constant 0 : index
    %c0_83 = arith.constant 0 : index
    %86 = vector.load %arg6[%c0_82, %c0_83] : memref<32x7xf32, #tpu.memory_space<vmem>>, vector<32x7xf32>
    %cst_84 = arith.constant dense<0.000000e+00> : vector<64x7xf32>
    %87 = tpu.matmul %85, %86, %cst_84 {dimension_numbers = #tpu.dot_dimension_numbers<[1], [0], [0], [1], [0, 0, 1, 1], [], []>} : vector<64x32xf32>, vector<32x7xf32>, vector<64x7xf32> -> vector<64x7xf32>
    %c9 = arith.constant 9 : index
    %c0_85 = arith.constant 0 : index
    %88 = vector.load %arg9[%c9, %c0_85] : memref<80x8xf32, #tpu.memory_space<vmem>>, vector<64x8xf32>
    %89 = vector.broadcast %7 : vector<64x1xf32> to vector<64x8xf32>
    %90 = arith.mulf %88, %89 : vector<64x8xf32>
    %c0_86 = arith.constant 0 : index
    %c0_87 = arith.constant 0 : index
    %c0_88 = arith.constant 0 : index
    %91 = vector.load %arg5[%c0_86, %c0_87, %c0_88] : memref<9x8x7xf32, #tpu.memory_space<vmem>>, vector<1x8x7xf32>
    %92 = vector.shape_cast %91 : vector<1x8x7xf32> to vector<8x7xf32>
    %cst_89 = arith.constant dense<0.000000e+00> : vector<64x7xf32>
    %93 = tpu.matmul %90, %92, %cst_89 {dimension_numbers = #tpu.dot_dimension_numbers<[1], [0], [0], [1], [0, 0, 1, 1], [], []>} : vector<64x8xf32>, vector<8x7xf32>, vector<64x7xf32> -> vector<64x7xf32>
    %94 = arith.addf %87, %93 : vector<64x7xf32>
    %c8_90 = arith.constant 8 : index
    %c0_91 = arith.constant 0 : index
    %95 = vector.load %arg9[%c8_90, %c0_91] : memref<80x8xf32, #tpu.memory_space<vmem>>, vector<64x8xf32>
    %c2_92 = arith.constant 2 : index
    %c0_93 = arith.constant 0 : index
    %c0_94 = arith.constant 0 : index
    %96 = vector.load %arg5[%c2_92, %c0_93, %c0_94] : memref<9x8x7xf32, #tpu.memory_space<vmem>>, vector<1x8x7xf32>
    %97 = vector.shape_cast %96 : vector<1x8x7xf32> to vector<8x7xf32>
    %cst_95 = arith.constant dense<0.000000e+00> : vector<64x7xf32>
    %98 = tpu.matmul %95, %97, %cst_95 {dimension_numbers = #tpu.dot_dimension_numbers<[1], [0], [0], [1], [0, 0, 1, 1], [], []>} : vector<64x8xf32>, vector<8x7xf32>, vector<64x7xf32> -> vector<64x7xf32>
    %99 = arith.addf %94, %98 : vector<64x7xf32>
    %c1_96 = arith.constant 1 : index
    %c0_97 = arith.constant 0 : index
    %100 = vector.load %arg9[%c1_96, %c0_97] : memref<80x8xf32, #tpu.memory_space<vmem>>, vector<64x8xf32>
    %101 = vector.broadcast %7 : vector<64x1xf32> to vector<64x8xf32>
    %102 = arith.mulf %100, %101 : vector<64x8xf32>
    %c6 = arith.constant 6 : index
    %c0_98 = arith.constant 0 : index
    %c0_99 = arith.constant 0 : index
    %103 = vector.load %arg5[%c6, %c0_98, %c0_99] : memref<9x8x7xf32, #tpu.memory_space<vmem>>, vector<1x8x7xf32>
    %104 = vector.shape_cast %103 : vector<1x8x7xf32> to vector<8x7xf32>
    %cst_100 = arith.constant dense<0.000000e+00> : vector<64x7xf32>
    %105 = tpu.matmul %102, %104, %cst_100 {dimension_numbers = #tpu.dot_dimension_numbers<[1], [0], [0], [1], [0, 0, 1, 1], [], []>} : vector<64x8xf32>, vector<8x7xf32>, vector<64x7xf32> -> vector<64x7xf32>
    %106 = arith.addf %99, %105 : vector<64x7xf32>
    %c0_101 = arith.constant 0 : index
    %c0_102 = arith.constant 0 : index
    %107 = vector.load %arg9[%c0_101, %c0_102] : memref<80x8xf32, #tpu.memory_space<vmem>>, vector<64x8xf32>
    %c8_103 = arith.constant 8 : index
    %c0_104 = arith.constant 0 : index
    %c0_105 = arith.constant 0 : index
    %108 = vector.load %arg5[%c8_103, %c0_104, %c0_105] : memref<9x8x7xf32, #tpu.memory_space<vmem>>, vector<1x8x7xf32>
    %109 = vector.shape_cast %108 : vector<1x8x7xf32> to vector<8x7xf32>
    %cst_106 = arith.constant dense<0.000000e+00> : vector<64x7xf32>
    %110 = tpu.matmul %107, %109, %cst_106 {dimension_numbers = #tpu.dot_dimension_numbers<[1], [0], [0], [1], [0, 0, 1, 1], [], []>} : vector<64x8xf32>, vector<8x7xf32>, vector<64x7xf32> -> vector<64x7xf32>
    %111 = arith.addf %106, %110 : vector<64x7xf32>
    %112 = vector.broadcast %8 : vector<1x7xf32> to vector<64x7xf32>
    %113 = arith.addf %111, %112 : vector<64x7xf32>
    %cst_107 = arith.constant 0.000000e+00 : f32
    %114 = vector.broadcast %cst_107 : f32 to vector<64x7xf32>
    %115 = arith.subf %114, %113 : vector<64x7xf32>
    %116 = math.exp %115 : vector<64x7xf32>
    %cst_108 = arith.constant 1.000000e+00 : f32
    %117 = vector.broadcast %cst_108 : f32 to vector<64x7xf32>
    %118 = arith.addf %117, %116 : vector<64x7xf32>
    %cst_109 = arith.constant 1.000000e+00 : f32
    %119 = vector.broadcast %cst_109 : f32 to vector<64x7xf32>
    %120 = arith.divf %119, %118 : vector<64x7xf32>
    %c0_110 = arith.constant 0 : index
    %c3_111 = arith.constant 3 : index
    %c0_112 = arith.constant 0 : index
    %c0_113 = arith.constant 0 : index
    %121 = vector.load %arg8[%c0_110, %c3_111, %c0_112, %c0_113] : memref<1x4x64x7xf32, #tpu.memory_space<vmem>>, vector<1x1x64x7xf32>
    %122 = vector.shape_cast %121 : vector<1x1x64x7xf32> to vector<64x7xf32>
    %123 = vector.shape_cast %120 : vector<64x7xf32> to vector<1x1x64x7xf32>
    tpu.vector_store %arg8[%c0_110, %c3_111, %c0_112, %c0_113], %123 {strides = array<i32>} : memref<1x4x64x7xf32, #tpu.memory_space<vmem>>, vector<1x1x64x7xf32>,
    return
  }
  func.func @transform_0(%arg0: i32) -> (i32, i32, i32) {
    %c0_i32 = arith.constant 0 : i32
    %c0_i32_0 = arith.constant 0 : i32
    %c0_i32_1 = arith.constant 0 : i32
    return %arg0, %c0_i32, %c0_i32_0 : i32, i32, i32
  }
  func.func @transform_1(%arg0: i32) -> (i32, i32, i32, i32) {
    %c0_i32 = arith.constant 0 : i32
    %c0_i32_0 = arith.constant 0 : i32
    %c0_i32_1 = arith.constant 0 : i32
    %c0_i32_2 = arith.constant 0 : i32
    return %arg0, %c0_i32, %c0_i32_0, %c0_i32_1 : i32, i32, i32, i32
  }
  func.func @transform_2(%arg0: i32) -> (i32, i32) {
    %c0_i32 = arith.constant 0 : i32
    %c0_i32_0 = arith.constant 0 : i32
    %c0_i32_1 = arith.constant 0 : i32
    return %c0_i32, %c0_i32_0 : i32, i32
  }
  func.func @transform_3(%arg0: i32) -> (i32, i32) {
    %c0_i32 = arith.constant 0 : i32
    %c0_i32_0 = arith.constant 0 : i32
    %c0_i32_1 = arith.constant 0 : i32
    return %c0_i32, %c0_i32_0 : i32, i32
  }
  func.func @transform_4(%arg0: i32) -> (i32, i32, i32) {
    %c0_i32 = arith.constant 0 : i32
    %c0_i32_0 = arith.constant 0 : i32
    %c0_i32_1 = arith.constant 0 : i32
    %c0_i32_2 = arith.constant 0 : i32
    return %c0_i32, %c0_i32_0, %c0_i32_1 : i32, i32, i32
  }
  func.func @transform_5(%arg0: i32) -> (i32, i32) {
    %c0_i32 = arith.constant 0 : i32
    %c0_i32_0 = arith.constant 0 : i32
    %c0_i32_1 = arith.constant 0 : i32
    return %c0_i32, %c0_i32_0 : i32, i32
  }
  func.func @transform_6(%arg0: i32) -> (i32, i32) {
    %c0_i32 = arith.constant 0 : i32
    %c0_i32_0 = arith.constant 0 : i32
    %c0_i32_1 = arith.constant 0 : i32
    return %c0_i32, %c0_i32_0 : i32, i32
  }
  func.func @transform_7(%arg0: i32) -> (i32, i32, i32, i32) {
    %c0_i32 = arith.constant 0 : i32
    %c0_i32_0 = arith.constant 0 : i32
    %c0_i32_1 = arith.constant 0 : i32
    %c0_i32_2 = arith.constant 0 : i32
    return %arg0, %c0_i32, %c0_i32_0, %c0_i32_1 : i32, i32, i32, i32
  }
}

</mosaic_0001>

<bundles_post_ra>
// kernel: prm_forward.1
= control target key start
LH: loop header
LB: loop body
LE: loop exit
PB: predicated region body
PF: predicated region fallthrough
CT: control target
= control target key end

     0   :  { %s2751_s24 = smov 0   ;;  %s3504_s0 = inlined_call_operand.vmem [shape: f32[2,64,288], index: 0, kind: input, shape index: {}]   ;;  %s3505_s1 = inlined_call_operand.vmem [shape: f32[2,4,64,32], index: 1, kind: input, shape index: {}]   ;;  %s3506_s2 = inlined_call_operand.vmem [shape: f32[64,1], index: 2, kind: input, shape index: {}]   ;;  %s3507_s3 = inlined_call_operand.vmem [shape: f32[288,8], index: 3, kind: input, shape index: {}]   ;;  %s3508_s4 = inlined_call_operand.vmem [shape: f32[9,8,7], index: 4, kind: input, shape index: {}]   ;;  %s3509_s5 = inlined_call_operand.vmem [shape: f32[32,7], index: 5, kind: input, shape index: {}]   ;;  %s3510_s6 = inlined_call_operand.vmem [shape: f32[1,7], index: 6, kind: input, shape index: {}]   ;;  %s3511_s7 = inlined_call_operand.vmem [shape: f32[2,4,64,7], index: 7, kind: output, shape index: {}]  }
   0x1 LB: > { %s2370_s25 = sadd.s32 4294967295, %s2707_s24   ;;  %p2374_p0 = scmp.ge.s32.totalorder %s2707_s24, 1  ;;  %s2707_s24 = sphi %s2751_s24, %s17_s24  }
   0x2   : > { %p247_p1 = scmp.lt.s32.totalorder %s2707_s24, 3 }
   0x4   : > { %p248_p2 = pnand %p2374_p0, %p247_p1 }
   0x5   : > { %p284_p3 = scmp.lt.s32.totalorder (!%p248_p2), %s2370_s25, 1 }
   0x6   : > { %251 = sbr.rel (%p248_p2) target bundleno = 614 (0x266), region = 48 }
   0xb   : > { %v338_v0 = vld [vmem:[%s3507_s3 + $0x78] sm:$0xff]  ;;  %v337_v2 = vld [vmem:[%s3507_s3 + $0x70] sm:$0xff]  ;;  %v336_v4 = vld [vmem:[%s3507_s3 + $0x68] sm:$0xff]  ;;  %s3513_s25 = smov (!%p284_p3, %s2370_s25), 1  ;;  %vm359_vm0 = vcmask 261120   ;;  %v2709_v37 = vmov 0  }
   0xc   : > { %v354_v1 = vld [vmem:[%s3507_s3 + $0xf8] sm:$0xff]  ;;  %384 = vmatpush.msra.mxu0 %v338_v0  ;;  %v353_v3 = vld [vmem:[%s3507_s3 + $0xf0] sm:$0xff]  ;;  %v352_v5 = vld [vmem:[%s3507_s3 + $0xe8] sm:$0xff]  ;;  %s2557_s23 = smul.u32 192, %s3513_s25  ;;  %2568 = vset.pattern.permute.xlu0 %v2709_v37  ;;  %s2550_s22 = sshll.u32 %s3513_s25, 8  ;;  %vm507_vm1 = vcmask 64512  }
   0xd   : > { %425 = vmatpush.msra.mxu1 %v354_v1  ;;  %v335_v6 = vld [vmem:[%s3507_s3 + $0x60] sm:$0xff]  ;;  %v334_v8 = vld [vmem:[%s3507_s3 + $0x58] sm:$0xff]  ;;  %v333_v11 = vld [vmem:[%s3507_s3 + $0x50] sm:$0xff]  ;;  %2569 = vset.pattern.permute.xlu1 %v2709_v37  ;;  %s2961_s28 = scalar_lea.vmem %s3505_s1, %s2550_s22  ;;  %s3262_s30 = scalar_lea.vmem %s3511_s7, %s2550_s22  ;;  %vm850_vm4 = vcmask 56320  }
   0xe   : > { %385 = vmatpush.msra.mxu0 %v337_v2  ;;  %v351_v7 = vld [vmem:[%s3507_s3 + $0xe0] sm:$0xff]  ;;  %v350_v9 = vld [vmem:[%s3507_s3 + $0xd8] sm:$0xff]  ;;  %v349_v12 = vld [vmem:[%s3507_s3 + $0xd0] sm:$0xff]  ;;  %s2816_s19 = scalar_lea.vmem %s3504_s0, %s2557_s23  ;;  %2570 = vset.pattern.permute.xlu2 %v2709_v37 }
   0xf   : > { %426 = vmatpush.msra.mxu1 %v353_v3  ;;  %v358_v10 = vld [vmem:[%s3507_s3 + $0x118] sm:$0xff]  ;;  %v357_v13 = vld [vmem:[%s3507_s3 + $0x110] sm:$0xff]  ;;  %v356_v14 = vld [vmem:[%s3507_s3 + $0x108] sm:$0xff] }
  0x10   : > { %386 = vmatpush.msra.mxu0 %v336_v4  ;;  %478 = vmatpush.msra.mxu2 %v358_v10  ;;  %v332_v15 = vld [vmem:[%s3507_s3 + $0x48] sm:$0xff]  ;;  %v355_v17 = vld [vmem:[%s3507_s3 + $0x100] sm:$0xff]  ;;  %v301_v20 = vld [vmem:[%s2816_s19 + $0x10] sm:$0xff] }
  0x11   : > { %427 = vmatpush.msra.mxu1 %v352_v5  ;;  %v348_v16 = vld [vmem:[%s3507_s3 + $0xc8] sm:$0xff]  ;;  %v331_v18 = vld [vmem:[%s3507_s3 + $0x40] sm:$0xff]  ;;  %v330_v21 = vld [vmem:[%s3507_s3 + $0x38] sm:$0xff] }
  0x12   : > { %387 = vmatpush.msra.mxu0 %v335_v6  ;;  %479 = vmatpush.msra.mxu2 %v357_v13  ;;  %v347_v19 = vld [vmem:[%s3507_s3 + $0xc0] sm:$0xff]  ;;  %v346_v22 = vld [vmem:[%s3507_s3 + $0xb8] sm:$0xff]  ;;  %v329_v23 = vld [vmem:[%s3507_s3 + $0x30] sm:$0xff] }
  0x13   : > { %428 = vmatpush.msra.mxu1 %v351_v7  ;;  %v345_v24 = vld [vmem:[%s3507_s3 + $0xb0] sm:$0xff]  ;;  %v328_v25 = vld [vmem:[%s3507_s3 + $0x28] sm:$0xff]  ;;  %v327_v27 = vld [vmem:[%s3507_s3 + $0x20] sm:$0xff] }
  0x14   : > { %388 = vmatpush.msra.mxu0 %v334_v8  ;;  %480 = vmatpush.msra.mxu2 %v356_v14  ;;  %v344_v26 = vld [vmem:[%s3507_s3 + $0xa8] sm:$0xff]  ;;  %v343_v28 = vld [vmem:[%s3507_s3 + $0xa0] sm:$0xff]  ;;  %v326_v30 = vld [vmem:[%s3507_s3 + $0x18] sm:$0xff]  ;;  %v2710_v14 = vmov 0.0  }
  0x15   : > { %429 = vmatpush.msra.mxu1 %v350_v9  ;;  %v304_v29 = vld [vmem:[%s2816_s19 + $0x28] sm:$0xff]  ;;  %v342_v31 = vld [vmem:[%s3507_s3 + $0x98] sm:$0xff]  ;;  %v325_v32 = vld [vmem:[%s3507_s3 + $0x10] sm:$0xff]  ;;  %508 = vst.msk [vmem:[#allocation2] sm:$0xff] %vm507_vm1, %v2710_v14 }
  0x16   : > { %389 = vmatpush.msra.mxu0 %v333_v11  ;;  %481 = vmatpush.msra.mxu2 %v355_v17  ;;  %v341_v33 = vld [vmem:[%s3507_s3 + $0x90] sm:$0xff]  ;;  %v526_v34 = vld [vmem:[%s3506_s2] sm:$0xff]  ;;  %v324_v35 = vld [vmem:[%s3507_s3 + $0x8] sm:$0xff]  ;;  %509 = vst.msk [vmem:[#allocation2 + $0x8] sm:$0xff] %vm507_vm1, %v2710_v14 }
  0x17   : > { %430 = vmatpush.msra.mxu1 %v349_v12  ;;  %2380 = vmatmul.msk.f32.vlgmr.msra.gmra.mxu2 %vm359_vm0, %v301_v20  ;;  %v340_v36 = vld [vmem:[%s3507_s3 + $0x88] sm:$0xff]  ;;  %v323_v38 = vld [vmem:[%s3507_s3] sm:$0xff]  ;;  %v302_v44 = vld [vmem:[%s2816_s19 + $0x18] sm:$0xff]  ;;  %510 = vst.msk [vmem:[#allocation2 + $0x10] sm:$0xff] %vm507_vm1, %v2710_v14 }
  0x18   : > { %390 = vmatpush.msra.mxu0 %v332_v15  ;;  %v339_v39 = vld [vmem:[%s3507_s3 + $0x80] sm:$0xff]  ;;  %882 = vperm.xlu0 %2568, %v526_v34   ;;  %v300_v41 = vld [vmem:[%s2816_s19 + $0x8] sm:$0xff]  ;;  %v310_v46 = vld [vmem:[%s2816_s19 + $0x58] sm:$0xff]  ;;  %511 = vst.msk [vmem:[#allocation2 + $0x18] sm:$0xff] %vm507_vm1, %v2710_v14 }
  0x19   : > { %431 = vmatpush.msra.mxu1 %v348_v16  ;;  %v299_v40 = vld [vmem:[%s2816_s19] sm:$0xff]  ;;  %v527_v43 = vld [vmem:[%s3506_s2 + $0x8] sm:$0xff]  ;;  %v528_v47 = vld [vmem:[%s3506_s2 + $0x10] sm:$0xff]  ;;  %512 = vst.msk [vmem:[#allocation2 + $0x20] sm:$0xff] %vm507_vm1, %v2710_v14 }
  0x1a   : > { %391 = vmatpush.msra.mxu0 %v331_v18  ;;  %v307_v42 = vld [vmem:[%s2816_s19 + $0x40] sm:$0xff]  ;;  %892 = vperm.xlu1 %2569, %v528_v47   ;;  %v305_v48 = vld [vmem:[%s2816_s19 + $0x30] sm:$0xff]  ;;  %v306_v49 = vld [vmem:[%s2816_s19 + $0x38] sm:$0xff]  ;;  %513 = vst.msk [vmem:[#allocation2 + $0x28] sm:$0xff] %vm507_vm1, %v2710_v14 }
  0x1b   : > { %432 = vmatpush.msra.mxu1 %v347_v19  ;;  %v303_v45 = vld [vmem:[%s2816_s19 + $0x20] sm:$0xff]  ;;  %v313_v50 = vld [vmem:[%s2816_s19 + $0x70] sm:$0xff]  ;;  %v529_v51 = vld [vmem:[%s3506_s2 + $0x18] sm:$0xff]  ;;  %514 = vst.msk [vmem:[#allocation2 + $0x30] sm:$0xff] %vm507_vm1, %v2710_v14 }
  0x1c   : > { %392 = vmatpush.msra.mxu0 %v330_v21  ;;  %v308_v52 = vld [vmem:[%s2816_s19 + $0x48] sm:$0xff]  ;;  %v309_v53 = vld [vmem:[%s2816_s19 + $0x50] sm:$0xff]  ;;  %v2909_v55 = vld [vmem:[%s3509_s5 + $0x18] sm:$0xff]  ;;  %515 = vst.msk [vmem:[#allocation2 + $0x38] sm:$0xff] %vm507_vm1, %v2710_v14 }
  0x1d   : > { %433 = vmatpush.msra.mxu1 %v346_v22  ;;  %v316_v54 = vld [vmem:[%s2816_s19 + $0x88] sm:$0xff]  ;;  %v2914_v56 = vld [vmem:[%s3509_s5 + $0x10] sm:$0xff]  ;;  %v533_v57 = vld [vmem:[%s3506_s2 + $0x38] sm:$0xff]  ;;  %516 = vst.msk [vmem:[#allocation2 + $0x40] sm:$0xff] %vm507_vm1, %v2710_v14 }
  0x1e   : > { %393 = vmatpush.msra.mxu0 %v329_v23  ;;  %v532_v58 = vld [vmem:[%s3506_s2 + $0x30] sm:$0xff]  ;;  %v2927_v59 = vld [vmem:[%s3509_s5 + $0x8] sm:$0xff]  ;;  %v2933_v60 = vld [vmem:[%s3509_s5] sm:$0xff]  ;;  %517 = vst.msk [vmem:[#allocation2 + $0x48] sm:$0xff] %vm507_vm1, %v2710_v14 }
  0x1f   : > { %434 = vmatpush.msra.mxu1 %v345_v24  ;;  %2381 = vmatmul.msk.f32.gmra.mxu2 %vm359_vm0, %v304_v29  ;;  %v311_v61 = vld [vmem:[%s2816_s19 + $0x60] sm:$0xff]  ;;  %v312_v62 = vld [vmem:[%s2816_s19 + $0x68] sm:$0xff]  ;;  %v314_v1 = vld [vmem:[%s2816_s19 + $0x78] sm:$0xff] }
  0x20   : > { %394 = vmatpush.msra.mxu0 %v328_v25  ;;  %887 = vperm.xlu0 %2568, %v527_v43   ;;  %v319_v63 = vld [vmem:[%s2816_s19 + $0xa0] sm:$0xff]  ;;  %v322_v3 = vld [vmem:[%s2816_s19 + $0xb8] sm:$0xff]  ;;  %v531_v4 = vld [vmem:[%s3506_s2 + $0x28] sm:$0xff] }
  0x21   : > { %435 = vmatpush.msra.mxu1 %v344_v26  ;;  %v530_v0 = vld [vmem:[%s3506_s2 + $0x20] sm:$0xff]  ;;  %v317_v5 = vld [vmem:[%s2816_s19 + $0x90] sm:$0xff]  ;;  %v318_v6 = vld [vmem:[%s2816_s19 + $0x98] sm:$0xff] }
  0x22   : > { %395 = vmatpush.msra.mxu0 %v327_v27  ;;  %897 = vperm.xlu1 %2569, %v529_v51   ;;  %v315_v2 = vld [vmem:[%s2816_s19 + $0x80] sm:$0xff]  ;;  %v320_v7 = vld [vmem:[%s2816_s19 + $0xa8] sm:$0xff]  ;;  %v321_v8 = vld [vmem:[%s2816_s19 + $0xb0] sm:$0xff] }
  0x23   : > { %436 = vmatpush.msra.mxu1 %v343_v28  ;;  %902 = vperm.xlu2 %2570, %v530_v0   ;;  %v2405_v9 = vld [vmem:[%s2961_s28 + $0x40] sm:$0xff]  ;;  %v2406_v10 = vld [vmem:[%s2961_s28 + $0x48] sm:$0xff]  ;;  %v2407_v11 = vld [vmem:[%s2961_s28 + $0x50] sm:$0xff] }
  0x24   : > { %396 = vmatpush.msra.mxu0 %v326_v30  ;;  %v2408_v12 = vld [vmem:[%s2961_s28 + $0x58] sm:$0xff]  ;;  %v2409_v13 = vld [vmem:[%s2961_s28 + $0x60] sm:$0xff]  ;;  %v2410_v15 = vld [vmem:[%s2961_s28 + $0x68] sm:$0xff] }
  0x25   : > { %437 = vmatpush.msra.mxu1 %v342_v31  ;;  %v2388_v16 = vld [vmem:[%s3508_s4 + $0x20] sm:$0xff]  ;;  %v2430_v17 = vld [vmem:[%s3508_s4 + $0x28] sm:$0xff]  ;;  %v2472_v18 = vld [vmem:[%s3508_s4 + $0x38] sm:$0xff] }
  0x26   : > { %397 = vmatpush.msra.mxu0 %v325_v32  ;;  %596 = vmatpush.msra.mxu3 %v2388_v16  ;;  %v2413_v19 = vld [vmem:[%s3508_s4 + $0x18] sm:$0xff]  ;;  %v2411_v20 = vld [vmem:[%s2961_s28 + $0x70] sm:$0xff] }
  0x27   : > { %438 = vmatpush.msra.mxu1 %v341_v33  ;;  %2382 = vmatmul.msk.f32.gmra.mxu2 %vm359_vm0, %v307_v42 }
  0x28   : > { %398 = vmatpush.msra.mxu0 %v324_v35  ;;  %912 = vperm.xlu0 %2568, %v532_v58  }
  0x29   : > { %439 = vmatpush.msra.mxu1 %v340_v36  ;;  %658 = vmatpush.msrb.mxu3 %v2909_v55 }
  0x2a   : > { %399 = vmatpush.msra.mxu0 %v323_v38  ;;  %917 = vperm.xlu1 %2569, %v533_v57  }
  0x2b   : > { %440 = vmatpush.msra.mxu1 %v339_v39  ;;  %400 = vmatmul.f32.vlgmr.msra.gmra.mxu0 %v299_v40 }
  0x2c   : > { %441 = vmatmul.f32.vlgmr.msra.gmra.mxu1 %v300_v41  ;;  %1031 = vmatpush.msrb.mxu0 %v2909_v55 }
  0x2d   : > { %907 = vperm.xlu2 %2570, %v531_v4   ;;  %1109 = vmatpush.msrb.mxu1 %v2430_v17 }
  0x2e   : > { %1032 = vmatpush.msrb.mxu0 %v2914_v56  ;;  %969 = vmatpush.msrb.mxu2 %v2413_v19 }
  0x2f   : > { %2383 = vmatmul.msk.f32.gmra.mxu2 %vm359_vm0, %v310_v46  ;;  %659 = vmatpush.msrb.mxu3 %v2914_v56 }
  0x30   : > { %1033 = vmatpush.msrb.mxu0 %v2927_v59  ;;  %2556 = vmatpush.msra.mxu2 %v2430_v17 }
  0x31   : > { %660 = vmatpush.msrb.mxu3 %v2927_v59 }
  0x32   : > { %1034 = vmatpush.msrb.mxu0 %v2933_v60 }
  0x33   : > { %403 = vmatmul.f32.gmra.mxu0 %v302_v44  ;;  %661 = vmatpush.msrb.mxu3 %v2933_v60 }
  0x34   : > { %444 = vmatmul.f32.gmra.mxu1 %v303_v45  ;;  %1514 = vmatpush.msra.mxu0 %v2472_v18 }
  0x37   : > { %2384 = vmatmul.msk.f32.gmra.mxu2 %vm359_vm0, %v313_v50 }
  0x3b   : > { %406 = vmatmul.f32.gmra.mxu0 %v305_v48 }
  0x3c   : > { %447 = vmatmul.f32.gmra.mxu1 %v306_v49 }
  0x3f   : > { %2385 = vmatmul.msk.f32.gmra.mxu2 %vm359_vm0, %v316_v54 }
  0x43   : > { %409 = vmatmul.f32.gmra.mxu0 %v308_v52 }
  0x44   : > { %450 = vmatmul.f32.gmra.mxu1 %v309_v53 }
  0x47   : > { %2386 = vmatmul.msk.f32.gmra.mxu2 %vm359_vm0, %v319_v63  ;;  %v1746_v63 = vld [vmem:[%s3508_s4] sm:$0xff] }
  0x48   : > { %1786 = vmatpush.msra.mxu1 %v1746_v63  ;;  %v1737_v63 = vld [vmem:[#allocation2 + $0x41] sm:$0xff] }
  0x4b   : > { %412 = vmatmul.f32.gmra.mxu0 %v311_v61 }
  0x4c   : > { %453 = vmatmul.f32.gmra.mxu1 %v312_v62 }
  0x4f   : > { %2387 = vmatmul.msk.f32.gmra.mxu2 %vm359_vm0, %v322_v3 }
  0x53   : > { %415 = vmatmul.f32.gmra.mxu0 %v314_v1  ;;  %v2522_v1 = vld [vmem:[%s3508_s4 + $0x30] sm:$0xff] }
  0x54   : > { %456 = vmatmul.f32.gmra.mxu1 %v315_v2 }
  0x5b   : > { %418 = vmatmul.f32.gmra.mxu0 %v317_v5 }
  0x5c   : > { %459 = vmatmul.f32.gmra.mxu1 %v318_v6 }
  0x63   : > { %421 = vmatmul.f32.gmra.mxu0 %v320_v7 }
  0x64   : > { %462 = vmatmul.f32.gmra.mxu1 %v321_v8 }
  0x6b   : > { %2422 = vmatmul.msk.f32.vlgmr.msrb.gmra.mxu0 %vm359_vm0, %v2405_v9 }
  0x6c   : > { %2017 = vmatpush.msrb.mxu0 %v2522_v1 }
  0x73   : > { %2423 = vmatmul.msk.f32.gmra.mxu0 %vm359_vm0, %v2406_v10 }
  0x7b   : > { %2424 = vmatmul.msk.f32.gmra.mxu0 %vm359_vm0, %v2407_v11 }
  0x7d   : > { %v903_v11 = vpop.permute.xlu2 %902 }
  0x83   : > { %2425 = vmatmul.msk.f32.gmra.mxu0 %vm359_vm0, %v2408_v12 }
  0x8a   : > { %v3014_v33 = vpop.permute.xlu0 %882 }
  0x8b   : > { %2426 = vmatmul.msk.f32.gmra.mxu0 %vm359_vm0, %v2409_v13 }
  0x8c   : > { %v3056_v51 = vpop.permute.xlu1 %892 }
  0x92   : > { %v3034_v46 = vpop.permute.xlu0 %887 }
  0x93   : > { %2427 = vmatmul.msk.f32.gmra.mxu0 %vm359_vm0, %v2410_v15 }
  0x94   : > { %v3081_v5 = vpop.permute.xlu1 %897 }
  0x9a   : > { %v483_v21 = vpop.f32.mrf.mxu2 }
  0x9b   : > { %2428 = vmatmul.msk.f32.gmra.mxu0 %vm359_vm0, %v2411_v20 }
  0xa2   : > { %v486_v22 = vpop.f32.mrf.mxu2 }
  0xa8   : > { %v401_v23 = vpop.f32.mrf.mxu0 }
  0xa9   : > { %v442_v24 = vpop.f32.mrf.mxu1 }
  0xaa   : > { %v443_v25 = vadd.f32 %v442_v24, %v401_v23  ;;  %v489_v27 = vpop.f32.mrf.mxu2  ;;  %v908_v23 = vpop.permute.xlu2 %907 }
  0xac   : > { %v484_v26 = vadd.f32 %v483_v21, %v443_v25 }
  0xae   : > { %518 = vst.msk [vmem:[#allocation2] sm:$0xff] %vm507_vm1, %v484_v26 }
  0xb0   : > { %v404_v28 = vpop.f32.mrf.mxu0 }
  0xb1   : > { %v445_v29 = vpop.f32.mrf.mxu1 }
  0xb2   : > { %v446_v30 = vadd.f32 %v445_v29, %v404_v28  ;;  %v492_v34 = vpop.f32.mrf.mxu2  ;;  %v913_v28 = vpop.permute.xlu0 %912 }
  0xb4   : > { %v487_v31 = vadd.f32 %v486_v22, %v446_v30 }
  0xb5   : > { %v3004_v32 = vld [vmem:[#allocation2] sm:$0xff] }
  0xb6   : > { %519 = vst.msk [vmem:[#allocation2 + $0x8] sm:$0xff] %vm507_vm1, %v487_v31  ;;  %2389 = vmatmul.msk.f32.vlgmr.msra.gmra.mxu3 %vm507_vm1, %v3004_v32  ;;  %2431 = vmatmul.msk.f32.vlgmr.msrb.gmra.mxu1 %vm507_vm1, %v3004_v32 }
  0xb7   : > { %2473 = vmatmul.msk.f32.vlgmr.msra.gmra.mxu0 %vm507_vm1, %v3004_v32  ;;  %2552 = vmatpush.msra.mxu3 %v2909_v55 }
  0xb8   : > { %v407_v35 = vpop.f32.mrf.mxu0 }
  0xb9   : > { %v448_v36 = vpop.f32.mrf.mxu1  ;;  %2553 = vmatpush.msra.mxu3 %v2914_v56 }
  0xba   : > { %v449_v37 = vadd.f32 %v448_v36, %v407_v35  ;;  %v495_v45 = vpop.f32.mrf.mxu2  ;;  %v918_v35 = vpop.permute.xlu1 %917 }
  0xbb   : > { %2554 = vmatpush.msra.mxu3 %v2927_v59  ;;  %v1745_v1 = vmul.f32 %v1737_v63, %v918_v35 }
  0xbc   : > { %v490_v38 = vadd.f32 %v489_v27, %v449_v37 }
  0xbd   : > { %v872_v39 = vld [vmem:[#allocation2 + $0x1] sm:$0xff]  ;;  %2555 = vmatpush.msra.mxu3 %v2933_v60 }
  0xbe   : > { %v3018_v40 = vld [vmem:[#allocation2 + $0x8] sm:$0xff]  ;;  %520 = vst.msk [vmem:[#allocation2 + $0x10] sm:$0xff] %vm507_vm1, %v490_v38  ;;  %v3023_v41 = vmul.f32 %v3014_v33, %v872_v39 }
  0xbf   : > { %2390 = vmatmul.msk.f32.gmra.mxu3 %vm507_vm1, %v3018_v40  ;;  %2432 = vmatmul.msk.f32.gmra.mxu1 %vm507_vm1, %v3018_v40  ;;  %v536_v39 = vld [vmem:[%s2961_s28 + $0x8] sm:$0xff] }
  0xc0   : > { %2474 = vmatmul.msk.f32.gmra.mxu0 %vm507_vm1, %v3018_v40  ;;  %2414 = vmatmul.msk.f32.vlgmr.msrb.gmra.mxu2 %vm507_vm1, %v3023_v41  ;;  %v410_v42 = vpop.f32.mrf.mxu0 }
  0xc1   : > { %v451_v43 = vpop.f32.mrf.mxu1  ;;  %1436 = vmatpush.msrb.mxu2 %v2909_v55 }
  0xc2   : > { %v452_v44 = vadd.f32 %v451_v43, %v410_v42  ;;  %v498_v58 = vpop.f32.mrf.mxu2  ;;  %v537_v43 = vld [vmem:[%s2961_s28 + $0x10] sm:$0xff] }
  0xc3   : > { %1437 = vmatpush.msrb.mxu2 %v2914_v56 }
  0xc4   : > { %v493_v47 = vadd.f32 %v492_v34, %v452_v44  ;;  %v2447_v44 = vld [vmem:[%s2961_s28 + $0x80] sm:$0xff] }
  0xc5   : > { %v3037_v48 = vld [vmem:[#allocation2 + $0x9] sm:$0xff]  ;;  %1438 = vmatpush.msrb.mxu2 %v2927_v59 }
  0xc6   : > { %v3039_v49 = vld [vmem:[#allocation2 + $0x10] sm:$0xff]  ;;  %521 = vst.msk [vmem:[#allocation2 + $0x18] sm:$0xff] %vm507_vm1, %v493_v47  ;;  %v3045_v50 = vmul.f32 %v3037_v48, %v3034_v46  ;;  %v1738_v29 = vmul.f32 %v3037_v48, %v3014_v33  ;;  %v535_v33 = vld [vmem:[%s2961_s28] sm:$0xff]  ;;  %v2448_v48 = vld [vmem:[%s2961_s28 + $0x88] sm:$0xff] }
  0xc7   : > { %2391 = vmatmul.msk.f32.gmra.mxu3 %vm507_vm1, %v3039_v49  ;;  %2433 = vmatmul.msk.f32.gmra.mxu1 %vm507_vm1, %v3039_v49 }
  0xc8   : > { %2475 = vmatmul.msk.f32.gmra.mxu0 %vm507_vm1, %v3039_v49  ;;  %1439 = vmatpush.msrb.mxu2 %v2933_v60  ;;  %v413_v52 = vpop.f32.mrf.mxu0 }
  0xc9   : > { %2415 = vmatmul.msk.f32.gmra.mxu2 %vm507_vm1, %v3045_v50  ;;  %v454_v53 = vpop.f32.mrf.mxu1 }
  0xca   : > { %v455_v54 = vadd.f32 %v454_v53, %v413_v52  ;;  %v501_v10 = vpop.f32.mrf.mxu2  ;;  %v2449_v52 = vld [vmem:[%s2961_s28 + $0x90] sm:$0xff]  ;;  %v2455_v53 = vld [vmem:[%s3508_s4 + $0x8] sm:$0xff] }
  0xcc   : > { %v496_v57 = vadd.f32 %v495_v45, %v455_v54  ;;  %v2531_v45 = vld [vmem:[%s3508_s4 + $0x40] sm:$0xff]  ;;  %v540_v54 = vld [vmem:[%s2961_s28 + $0x28] sm:$0xff] }
  0xcd   : > { %v3058_v61 = vld [vmem:[#allocation2 + $0x11] sm:$0xff]  ;;  %2100 = vmatpush.msrb.mxu1 %v2531_v45 }
  0xce   : > { %v3060_v62 = vld [vmem:[#allocation2 + $0x18] sm:$0xff]  ;;  %522 = vst.msk [vmem:[#allocation2 + $0x20] sm:$0xff] %vm507_vm1, %v496_v57  ;;  %v3068_v0 = vmul.f32 %v3058_v61, %v3056_v51  ;;  %v1739_v37 = vmul.f32 %v3058_v61, %v3034_v46  ;;  %v2513_v61 = vld [vmem:[%s3508_s4 + $0x10] sm:$0xff] }
  0xcf   : > { %2392 = vmatmul.msk.f32.gmra.mxu3 %vm507_vm1, %v3060_v62  ;;  %2434 = vmatmul.msk.f32.gmra.mxu1 %vm507_vm1, %v3060_v62  ;;  %v538_v46 = vld [vmem:[%s2961_s28 + $0x18] sm:$0xff] }
  0xd0   : > { %2476 = vmatmul.msk.f32.gmra.mxu0 %vm507_vm1, %v3060_v62  ;;  %v416_v2 = vpop.f32.mrf.mxu0 }
  0xd1   : > { %2416 = vmatmul.msk.f32.gmra.mxu2 %vm507_vm1, %v3068_v0  ;;  %v457_v3 = vpop.f32.mrf.mxu1 }
  0xd2   : > { %v458_v4 = vadd.f32 %v457_v3, %v416_v2  ;;  %v504_v19 = vpop.f32.mrf.mxu2  ;;  %v2451_v2 = vld [vmem:[%s2961_s28 + $0xa0] sm:$0xff]  ;;  %v542_v3 = vld [vmem:[%s2961_s28 + $0x38] sm:$0xff] }
  0xd4   : > { %v499_v6 = vadd.f32 %v498_v58, %v458_v4  ;;  %v2450_v58 = vld [vmem:[%s2961_s28 + $0x98] sm:$0xff]  ;;  %v2452_v4 = vld [vmem:[%s2961_s28 + $0xa8] sm:$0xff] }
  0xd5   : > { %v1732_v7 = vld [vmem:[#allocation2 + $0x19] sm:$0xff] }
  0xd6   : > { %v3083_v8 = vld [vmem:[#allocation2 + $0x20] sm:$0xff]  ;;  %523 = vst.msk [vmem:[#allocation2 + $0x28] sm:$0xff] %vm507_vm1, %v499_v6  ;;  %v3087_v9 = vmul.f32 %v1732_v7, %v3081_v5  ;;  %v1740_v42 = vmul.f32 %v1732_v7, %v3056_v51  ;;  %v2453_v6 = vld [vmem:[%s2961_s28 + $0xb0] sm:$0xff] }
  0xd7   : > { %2393 = vmatmul.msk.f32.gmra.mxu3 %vm507_vm1, %v3083_v8  ;;  %2435 = vmatmul.msk.f32.gmra.mxu1 %vm507_vm1, %v3083_v8 }
  0xd8   : > { %2477 = vmatmul.msk.f32.gmra.mxu0 %vm507_vm1, %v3083_v8  ;;  %v419_v12 = vpop.f32.mrf.mxu0 }
  0xd9   : > { %2417 = vmatmul.msk.f32.gmra.mxu2 %vm507_vm1, %v3087_v9  ;;  %v460_v13 = vpop.f32.mrf.mxu1 }
  0xda   : > { %v461_v14 = vadd.f32 %v460_v13, %v419_v12 }
  0xdc   : > { %v502_v15 = vadd.f32 %v501_v10, %v461_v14 }
  0xdd   : > { %v1733_v16 = vld [vmem:[#allocation2 + $0x21] sm:$0xff] }
  0xde   : > { %v3097_v17 = vld [vmem:[#allocation2 + $0x28] sm:$0xff]  ;;  %524 = vst.msk [vmem:[#allocation2 + $0x30] sm:$0xff] %vm507_vm1, %v502_v15  ;;  %v3100_v18 = vmul.f32 %v1733_v16, %v903_v11 }
  0xdf   : > { %2394 = vmatmul.msk.f32.gmra.mxu3 %vm507_vm1, %v3097_v17  ;;  %2436 = vmatmul.msk.f32.gmra.mxu1 %vm507_vm1, %v3097_v17 }
  0xe0   : > { %2478 = vmatmul.msk.f32.gmra.mxu0 %vm507_vm1, %v3097_v17  ;;  %v422_v20 = vpop.f32.mrf.mxu0 }
  0xe1   : > { %2418 = vmatmul.msk.f32.gmra.mxu2 %vm507_vm1, %v3100_v18  ;;  %v463_v21 = vpop.f32.mrf.mxu1 }
  0xe2   : > { %v464_v22 = vadd.f32 %v463_v21, %v422_v20 }
  0xe4   : > { %v505_v24 = vadd.f32 %v504_v19, %v464_v22 }
  0xe5   : > { %v1734_v25 = vld [vmem:[#allocation2 + $0x29] sm:$0xff] }
  0xe6   : > { %v3110_v26 = vld [vmem:[#allocation2 + $0x30] sm:$0xff]  ;;  %525 = vst.msk [vmem:[#allocation2 + $0x38] sm:$0xff] %vm507_vm1, %v505_v24  ;;  %v925_v27 = vmul.f32 %v1734_v25, %v908_v23  ;;  %v1742_v47 = vmul.f32 %v1734_v25, %v903_v11 }
  0xe7   : > { %2395 = vmatmul.msk.f32.gmra.mxu3 %vm507_vm1, %v3110_v26  ;;  %2437 = vmatmul.msk.f32.gmra.mxu1 %vm507_vm1, %v3110_v26 }
  0xe8   : > { %2479 = vmatmul.msk.f32.gmra.mxu0 %vm507_vm1, %v3110_v26  ;;  %v1036_v7 = vpop.f32.mrf.mxu0 }
  0xe9   : > { %2419 = vmatmul.msk.f32.gmra.mxu2 %vm507_vm1, %v925_v27 }
  0xed   : > { %v1735_v30 = vld [vmem:[#allocation2 + $0x31] sm:$0xff]  ;;  %v879_v36 = vld [vmem:[#allocation2 + $0x39] sm:$0xff] }
  0xee   : > { %v3122_v31 = vld [vmem:[#allocation2 + $0x38] sm:$0xff]  ;;  %v926_v34 = vmul.f32 %v1735_v30, %v913_v28  ;;  %v927_v38 = vmul.f32 %v918_v35, %v879_v36  ;;  %v1743_v51 = vmul.f32 %v1735_v30, %v908_v23  ;;  %v1744_v57 = vmul.f32 %v913_v28, %v879_v36 }
  0xef   : > { %2396 = vmatmul.msk.f32.gmra.mxu3 %vm507_vm1, %v3122_v31  ;;  %2497 = vmatmul.msk.f32.vlgmr.msra.gmra.mxu1 %vm507_vm1, %v1738_v29 }
  0xf0   : > { %2480 = vmatmul.msk.f32.gmra.mxu0 %vm507_vm1, %v3122_v31 }
  0xf1   : > { %2420 = vmatmul.msk.f32.gmra.mxu2 %vm507_vm1, %v926_v34 }
  0xf7   : > { %2397 = vmatmul.msk.f32.vlgmr.msrb.gmra.mxu3 %vm359_vm0, %v535_v33  ;;  %2498 = vmatmul.msk.f32.gmra.mxu1 %vm507_vm1, %v1739_v37 }
  0xf8   : > { %2523 = vmatmul.msk.f32.vlgmr.msrb.gmra.mxu0 %vm507_vm1, %v3023_v41  ;;  %v1741_v41 = vmul.f32 %v1733_v16, %v3081_v5  ;;  %1374 = vmatpush.msrb.mxu3 %v2455_v53  ;;  %v2412_v5 = vld [vmem:[%s2961_s28 + $0x78] sm:$0xff] }
  0xf9   : > { %2421 = vmatmul.msk.f32.gmra.mxu2 %vm507_vm1, %v927_v38 }
  0xff   : > { %2398 = vmatmul.msk.f32.gmra.mxu3 %vm359_vm0, %v536_v39  ;;  %2499 = vmatmul.msk.f32.gmra.mxu1 %vm507_vm1, %v1740_v42 }
 0x100   : > { %2524 = vmatmul.msk.f32.gmra.mxu0 %vm507_vm1, %v3045_v50  ;;  %v539_v50 = vld [vmem:[%s2961_s28 + $0x20] sm:$0xff] }
 0x101   : > { %2438 = vmatmul.msk.f32.vlgmr.msra.gmra.mxu2 %vm507_vm1, %v3122_v31 }
 0x102   : > { %1926 = vmatpush.msra.mxu2 %v2513_v61 }
 0x107   : > { %2399 = vmatmul.msk.f32.gmra.mxu3 %vm359_vm0, %v537_v43  ;;  %2500 = vmatmul.msk.f32.gmra.mxu1 %vm507_vm1, %v1741_v41 }
 0x108   : > { %2525 = vmatmul.msk.f32.gmra.mxu0 %vm507_vm1, %v3068_v0  ;;  %v541_v0 = vld [vmem:[%s2961_s28 + $0x30] sm:$0xff] }
 0x109   : > { %2464 = vmatmul.msk.f32.vlgmr.msrb.gmra.mxu2 %vm359_vm0, %v2447_v44 }
 0x10f   : > { %2400 = vmatmul.msk.f32.gmra.mxu3 %vm359_vm0, %v538_v46  ;;  %2501 = vmatmul.msk.f32.gmra.mxu1 %vm507_vm1, %v1742_v47 }
 0x110   : > { %2526 = vmatmul.msk.f32.gmra.mxu0 %vm507_vm1, %v3087_v9 }
 0x111   : > { %2465 = vmatmul.msk.f32.gmra.mxu2 %vm359_vm0, %v2448_v48 }
 0x117   : > { %2401 = vmatmul.msk.f32.gmra.mxu3 %vm359_vm0, %v539_v50  ;;  %2502 = vmatmul.msk.f32.gmra.mxu1 %vm507_vm1, %v1743_v51 }
 0x118   : > { %2527 = vmatmul.msk.f32.gmra.mxu0 %vm507_vm1, %v3100_v18 }
 0x119   : > { %2466 = vmatmul.msk.f32.gmra.mxu2 %vm359_vm0, %v2449_v52 }
 0x11f   : > { %2402 = vmatmul.msk.f32.gmra.mxu3 %vm359_vm0, %v540_v54  ;;  %2503 = vmatmul.msk.f32.gmra.mxu1 %vm507_vm1, %v1744_v57 }
 0x120   : > { %2528 = vmatmul.msk.f32.gmra.mxu0 %vm507_vm1, %v925_v27 }
 0x121   : > { %2467 = vmatmul.msk.f32.gmra.mxu2 %vm359_vm0, %v2450_v58 }
 0x127   : > { %2403 = vmatmul.msk.f32.gmra.mxu3 %vm359_vm0, %v541_v0  ;;  %2504 = vmatmul.msk.f32.gmra.mxu1 %vm507_vm1, %v1745_v1 }
 0x128   : > { %2529 = vmatmul.msk.f32.gmra.mxu0 %vm507_vm1, %v926_v34 }
 0x129   : > { %2468 = vmatmul.msk.f32.gmra.mxu2 %vm359_vm0, %v2451_v2 }
 0x12f   : > { %2404 = vmatmul.msk.f32.gmra.mxu3 %vm359_vm0, %v542_v3  ;;  %2532 = vmatmul.msk.f32.vlgmr.msrb.gmra.mxu1 %vm507_vm1, %v3004_v32  ;;  %v2454_v32 = vld [vmem:[%s2961_s28 + $0xb8] sm:$0xff] }
 0x130   : > { %2530 = vmatmul.msk.f32.gmra.mxu0 %vm507_vm1, %v927_v38 }
 0x131   : > { %2469 = vmatmul.msk.f32.gmra.mxu2 %vm359_vm0, %v2452_v4 }
 0x133   : > { %v1111_v10 = vpop.f32.mrf.mxu1 }
 0x137   : > { %2429 = vmatmul.msk.f32.vlgmr.msra.gmra.mxu3 %vm359_vm0, %v2412_v5  ;;  %2533 = vmatmul.msk.f32.gmra.mxu1 %vm507_vm1, %v3018_v40 }
 0x138   : > { %1848 = vmatpush.msra.mxu3 %v2909_v55  ;;  %v1039_v55 = vpop.f32.mrf.mxu0 }
 0x139   : > { %2470 = vmatmul.msk.f32.gmra.mxu2 %vm359_vm0, %v2453_v6  ;;  %v3203_v9 = vpop.f32.mrf.mxu3 }
 0x13a   : > { %1849 = vmatpush.msra.mxu3 %v2914_v56  ;;  %v3219_v56 = vld [vmem:[%s3510_s6] ss:$0 sm:$0xff] }
 0x13c   : > { %1850 = vmatpush.msra.mxu3 %v2927_v59  ;;  %v1114_v13 = vpop.f32.mrf.mxu1 }
 0x13e   : > { %1851 = vmatpush.msra.mxu3 %v2933_v60 }
 0x13f   : > { %2456 = vmatmul.msk.f32.vlgmr.msrb.gmra.mxu3 %vm507_vm1, %v3018_v40  ;;  %2534 = vmatmul.msk.f32.gmra.mxu1 %vm507_vm1, %v3039_v49 }
 0x140   : > { %v1042_v18 = vpop.f32.mrf.mxu0 }
 0x141   : > { %2471 = vmatmul.msk.f32.gmra.mxu2 %vm359_vm0, %v2454_v32 }
 0x142   : > { %v3214_v11 = vpop.f32.mrf.mxu3 }
 0x143   : > { %v971_v12 = vpop.f32.mrf.mxu2 }
 0x144   : > { %v1037_v59 = vadd.f32 %v1036_v7, %v971_v12  ;;  %v1117_v22 = vpop.f32.mrf.mxu1 }
 0x146   : > { %v1135_v60 = vadd.f32 %v1111_v10, %v1037_v59 }
 0x147   : > { %2457 = vmatmul.msk.f32.gmra.mxu3 %vm507_vm1, %v3039_v49  ;;  %2535 = vmatmul.msk.f32.gmra.mxu1 %vm507_vm1, %v3060_v62 }
 0x148   : > { %v1143_v14 = vadd.f32 %v3219_v56, %v1135_v60  ;;  %v1045_v34 = vpop.f32.mrf.mxu0 }
 0x149   : > { %2514 = vmatmul.msk.f32.vlgmr.msra.gmra.mxu2 %vm507_vm1, %v3018_v40 }
 0x14a   : > { %v3228_v15 = vpop.f32.mrf.mxu3  ;;  %v1151_v16 = vsub.f32 0.0, %v1143_v14 }
 0x14c   : > { %v974_v19 = vpop.f32.mrf.mxu2  ;;  %v1159_v20 = vmul.f32 1.442695, %v1151_v16  ;;  %v1120_v33 = vpop.f32.mrf.mxu1 }
 0x14d   : > { %v1040_v21 = vadd.f32 %v1039_v55, %v974_v19 }
 0x14e   : > { %2572 = vpow2.f32 %v1159_v20 }
 0x14f   : > { %v1136_v23 = vadd.f32 %v1114_v13, %v1040_v21  ;;  %2458 = vmatmul.msk.f32.gmra.mxu3 %vm507_vm1, %v3060_v62  ;;  %2536 = vmatmul.msk.f32.gmra.mxu1 %vm507_vm1, %v3083_v8 }
 0x150   : > { %v1048_v48 = vpop.f32.mrf.mxu0 }
 0x151   : > { %v1144_v24 = vadd.f32 %v3219_v56, %v1136_v23  ;;  %2515 = vmatmul.msk.f32.gmra.mxu2 %vm507_vm1, %v3039_v49 }
 0x152   : > { %v3237_v40 = vpop.f32.mrf.mxu3 }
 0x153   : > { %v1152_v25 = vsub.f32 0.0, %v1144_v24 }
 0x154   : > { %v977_v27 = vpop.f32.mrf.mxu2  ;;  %v2573_v28 = vpop.eup %2572 }
 0x155   : > { %v1161_v29 = vmul.f32 1.442695, %v1152_v25  ;;  %v1043_v30 = vadd.f32 %v1042_v18, %v977_v27  ;;  %v1175_v35 = vadd.f32 1.0, %v2573_v28  ;;  %v1123_v57 = vpop.f32.mrf.mxu1 }
 0x157   : > { %2574 = vpow2.f32 %v1161_v29  ;;  %v1137_v36 = vadd.f32 %v1117_v22, %v1043_v30  ;;  %2459 = vmatmul.msk.f32.gmra.mxu3 %vm507_vm1, %v3083_v8  ;;  %2537 = vmatmul.msk.f32.gmra.mxu1 %vm507_vm1, %v3097_v17  ;;  %v1194_v51 = vand.u32 2147483648, %v1175_v35  ;;  %v1192_v54 = vand.u32 2147483647, %v1175_v35 }
 0x158   : > { %2576 = vrcp.f32 %v1175_v35  ;;  %vm1188_vm3 = vweird.f32 %v1175_v35  ;;  %v1051_v55 = vpop.f32.mrf.mxu0 }
 0x159   : > { %v1145_v49 = vadd.f32 %v3219_v56, %v1137_v36  ;;  %2516 = vmatmul.msk.f32.gmra.mxu2 %vm507_vm1, %v3060_v62  ;;  %vm1193_vm6 = vcmp.eq.f32.partialorder %v1192_v54, 8.507059e+37 }
 0x15a   : > { %v3246_v37 = vpop.f32.mrf.mxu3 }
 0x15b   : > { %v1153_v38 = vsub.f32 0.0, %v1145_v49 }
 0x15c   : > { %v980_v39 = vpop.f32.mrf.mxu2 }
 0x15d   : > { %v2575_v42 = vpop.eup %2574  ;;  %v1163_v43 = vmul.f32 1.442695, %v1153_v38  ;;  %v1046_v41 = vadd.f32 %v1045_v34, %v980_v39  ;;  %v1126_v20 = vpop.f32.mrf.mxu1 }
 0x15e   : > { %v2577_v44 = vpop.eup %2576  ;;  %v1176_v45 = vadd.f32 1.0, %v2575_v42 }
 0x15f   : > { %v1184_v46 = vmul.f32 %v2577_v44, %v1175_v35  ;;  %2578 = vpow2.f32 %v1163_v43  ;;  %v1138_v47 = vadd.f32 %v1120_v33, %v1046_v41  ;;  %2460 = vmatmul.msk.f32.gmra.mxu3 %vm507_vm1, %v3097_v17  ;;  %2538 = vmatmul.msk.f32.gmra.mxu1 %vm507_vm1, %v3110_v26  ;;  %vm1189_vm2 = vweird.f32 %v2577_v44  ;;  %v1332_v43 = vld [vmem:[#allocation2 + $0x40] sm:$0xff] }
 0x160   : > { %2580 = vrcp.f32 %v1176_v45  ;;  %vm1190_vm5 = vmor %vm1188_vm3, %vm1189_vm2  ;;  %v1209_v12 = vand.u32 2147483648, %v1176_v45  ;;  %v1207_v60 = vand.u32 2147483647, %v1176_v45  ;;  %vm1203_vm8 = vweird.f32 %v1176_v45  ;;  %v1054_v39 = vpop.f32.mrf.mxu0 }
 0x161   : > { %v1185_v62 = vsub.f32 1.0, %v1184_v46  ;;  %v1146_v50 = vadd.f32 %v3219_v56, %v1138_v47  ;;  %2517 = vmatmul.msk.f32.gmra.mxu2 %vm507_vm1, %v3083_v8  ;;  %v1195_v8 = vor.u32 1.1754944e-38, %v1194_v51 }
 0x162   : > { %v3255_v52 = vpop.f32.mrf.mxu3  ;;  %vm1208_vm10 = vcmp.eq.f32.partialorder %v1207_v60, 8.507059e+37 }
 0x163   : > { %v1186_v53 = vmul.f32 %v2577_v44, %v1185_v62  ;;  %v1154_v58 = vsub.f32 0.0, %v1146_v50 }
 0x164   : > { %v983_v61 = vpop.f32.mrf.mxu2 }
 0x165   : > { %v2579_v63 = vpop.eup %2578  ;;  %v1187_v0 = vadd.f32 %v2577_v44, %v1186_v53  ;;  %v1165_v1 = vmul.f32 1.442695, %v1154_v58  ;;  %v1049_v2 = vadd.f32 %v1048_v48, %v983_v61  ;;  %v1129_v50 = vpop.f32.mrf.mxu1 }
 0x166   : > { %v2581_v3 = vpop.eup %2580  ;;  %v1177_v4 = vadd.f32 1.0, %v2579_v63 }
 0x167   : > { %v1191_v5 = vsel %vm1190_vm5, %v2577_v44, %v1187_v0  ;;  %v1199_v6 = vmul.f32 %v2581_v3, %v1176_v45  ;;  %2582 = vpow2.f32 %v1165_v1  ;;  %2461 = vmatmul.msk.f32.gmra.mxu3 %vm507_vm1, %v3110_v26  ;;  %2539 = vmatmul.msk.f32.gmra.mxu1 %vm507_vm1, %v3122_v31  ;;  %v1139_v32 = vadd.f32 %v1123_v57, %v1049_v2 }
 0x168   : > { %v1196_v7 = vsel %vm1193_vm6, %v1195_v8, %v1191_v5  ;;  %2584 = vrcp.f32 %v1177_v4  ;;  %vm1204_vm7 = vweird.f32 %v2581_v3  ;;  %v1224_v35 = vand.u32 2147483648, %v1177_v4  ;;  %v2489_v8 = vld [vmem:[%s2961_s28 + $0xc0] sm:$0xff] }
 0x169   : > { %2439 = vst.msk [vmem:[%s3262_s30 + $0x40] sm:$0xff] %vm850_vm4, %v1196_v7  ;;  %v1200_v10 = vsub.f32 1.0, %v1199_v6  ;;  %2518 = vmatmul.msk.f32.gmra.mxu2 %vm507_vm1, %v3097_v17  ;;  %v1147_v14 = vadd.f32 %v3219_v56, %v1139_v32  ;;  %vm1205_vm9 = vmor %vm1203_vm8, %vm1204_vm7  ;;  %v1210_v17 = vor.u32 1.1754944e-38, %v1209_v12  ;;  %v1222_v49 = vand.u32 2147483647, %v1177_v4 }
 0x16a   : > { %v3272_v13 = vpop.f32.mrf.mxu3  ;;  %vm1218_vm12 = vweird.f32 %v1177_v4  ;;  %v1225_v47 = vor.u32 1.1754944e-38, %v1224_v35 }
 0x16b   : > { %v1201_v59 = vmul.f32 %v2581_v3, %v1200_v10  ;;  %v1155_v21 = vsub.f32 0.0, %v1147_v14  ;;  %vm1223_vm14 = vcmp.eq.f32.partialorder %v1222_v49, 8.507059e+37 }
 0x16c   : > { %v986_v16 = vpop.f32.mrf.mxu2 }
 0x16d   : > { %v2583_v18 = vpop.eup %2582  ;;  %v1202_v19 = vadd.f32 %v2581_v3, %v1201_v59  ;;  %v1052_v22 = vadd.f32 %v1051_v55, %v986_v16  ;;  %v1167_v28 = vmul.f32 1.442695, %v1155_v21  ;;  %v2490_v21 = vld [vmem:[%s2961_s28 + $0xc8] sm:$0xff] }
 0x16e   : > { %v2585_v23 = vpop.eup %2584  ;;  %v1178_v24 = vadd.f32 1.0, %v2583_v18 }
 0x16f   : > { %v1206_v25 = vsel %vm1205_vm9, %v2581_v3, %v1202_v19  ;;  %v1214_v27 = vmul.f32 %v2585_v23, %v1177_v4  ;;  %2462 = vmatmul.msk.f32.gmra.mxu3 %vm507_vm1, %v3122_v31  ;;  %v1140_v34 = vadd.f32 %v1126_v20, %v1052_v22  ;;  %vm1219_vm11 = vweird.f32 %v2585_v23 }
 0x170   : > { %v1211_v29 = vsel %vm1208_vm10, %v1210_v17, %v1206_v25  ;;  %2586 = vrcp.f32 %v1178_v24  ;;  %vm1220_vm13 = vmor %vm1218_vm12, %vm1219_vm11  ;;  %v1237_v61 = vand.u32 2147483647, %v1178_v24  ;;  %v1239_v63 = vand.u32 2147483648, %v1178_v24 }
 0x171   : > { %2440 = vst.msk [vmem:[%s3262_s30 + $0x48] sm:$0xff] %vm850_vm4, %v1211_v29  ;;  %v1215_v30 = vsub.f32 1.0, %v1214_v27  ;;  %2588 = vpow2.f32 %v1167_v28  ;;  %2519 = vmatmul.msk.f32.gmra.mxu2 %vm507_vm1, %v3110_v26  ;;  %v1148_v38 = vadd.f32 %v3219_v56, %v1140_v34  ;;  %vm1233_vm2 = vweird.f32 %v1178_v24 }
 0x172   : > { %v3281_v36 = vpop.f32.mrf.mxu3  ;;  %v1240_v7 = vor.u32 1.1754944e-38, %v1239_v63  ;;  %vm1238_vm5 = vcmp.eq.f32.partialorder %v1237_v61, 8.507059e+37 }
 0x173   : > { %v1216_v33 = vmul.f32 %v2585_v23, %v1215_v30  ;;  %v1156_v44 = vsub.f32 0.0, %v1148_v38 }
 0x174   : > { %v989_v42 = vpop.f32.mrf.mxu2 }
 0x175   : > { %v1217_v41 = vadd.f32 %v2585_v23, %v1216_v33  ;;  %v1055_v45 = vadd.f32 %v1054_v39, %v989_v42  ;;  %v1169_v51 = vmul.f32 1.442695, %v1156_v44  ;;  %v2491_v44 = vld [vmem:[%s2961_s28 + $0xd0] sm:$0xff] }
 0x176   : > { %v2587_v46 = vpop.eup %2586 }
 0x177   : > { %v2589_v26 = vpop.eup %2588  ;;  %v1221_v48 = vsel %vm1220_vm13, %v2585_v23, %v1217_v41  ;;  %v1229_v62 = vmul.f32 %v2587_v46, %v1178_v24  ;;  %2463 = vmatmul.msk.f32.gmra.mxu3 %vm507_vm1, %v1332_v43  ;;  %v1141_v57 = vadd.f32 %v1129_v50, %v1055_v45  ;;  %2590 = vpow2.f32 %v1169_v51 }
 0x178   : > { %v1226_v53 = vsel %vm1223_vm14, %v1225_v47, %v1221_v48  ;;  %v1179_v54 = vadd.f32 1.0, %v2589_v26  ;;  %vm1234_vm15 = vweird.f32 %v2587_v46 }
 0x179   : > { %2441 = vst.msk [vmem:[%s3262_s30 + $0x50] sm:$0xff] %vm850_vm4, %v1226_v53  ;;  %v1230_v58 = vsub.f32 1.0, %v1229_v62  ;;  %2520 = vmatmul.msk.f32.gmra.mxu2 %vm507_vm1, %v3122_v31  ;;  %v1149_v2 = vadd.f32 %v3219_v56, %v1141_v57  ;;  %vm1235_vm3 = vmor %vm1233_vm2, %vm1234_vm15 }
 0x17a   : > { %2592 = vrcp.f32 %v1179_v54  ;;  %v663_v0 = vpop.f32.mrf.mxu3  ;;  %v1254_v20 = vand.u32 2147483648, %v1179_v54  ;;  %v1252_v23 = vand.u32 2147483647, %v1179_v54  ;;  %vm1248_vm7 = vweird.f32 %v1179_v54 }
 0x17b   : > { %v1231_v1 = vmul.f32 %v2587_v46, %v1230_v58  ;;  %v664_v3 = vadd.f32 %v663_v0, %v3203_v9  ;;  %v1157_v5 = vsub.f32 0.0, %v1149_v2 }
 0x17c   : > { %v1255_v29 = vor.u32 1.1754944e-38, %v1254_v20  ;;  %vm1253_vm8 = vcmp.eq.f32.partialorder %v1252_v23, 8.507059e+37 }
 0x17d   : > { %v1232_v4 = vadd.f32 %v2587_v46, %v1231_v1  ;;  %v690_v6 = vadd.f32 %v3219_v56, %v664_v3  ;;  %v2591_v31 = vpop.eup %2590  ;;  %v1171_v32 = vmul.f32 1.442695, %v1157_v5 }
 0x17e   : > { %v1180_v9 = vadd.f32 1.0, %v2591_v31 }
 0x17f   : > { %v1236_v10 = vsel %vm1235_vm3, %v2587_v46, %v1232_v4  ;;  %v698_v55 = vsub.f32 0.0, %v690_v6  ;;  %2505 = vmatmul.msk.f32.vlgmr.msra.gmra.mxu3 %vm359_vm0, %v2489_v8  ;;  %2594 = vpow2.f32 %v1171_v32  ;;  %v3321_v8 = vpop.f32.mrf.mxu2  ;;  %v2492_v4 = vld [vmem:[%s2961_s28 + $0xd8] sm:$0xff] }
 0x180   : > { %v2593_v12 = vpop.eup %2592  ;;  %v1241_v59 = vsel %vm1238_vm5, %v1240_v7, %v1236_v10  ;;  %2596 = vrcp.f32 %v1180_v9  ;;  %v1267_v46 = vand.u32 2147483647, %v1180_v9  ;;  %vm1263_vm10 = vweird.f32 %v1180_v9 }
 0x181   : > { %2442 = vst.msk [vmem:[%s3262_s30 + $0x58] sm:$0xff] %vm850_vm4, %v1241_v59  ;;  %v1244_v60 = vmul.f32 %v2593_v12, %v1179_v54  ;;  %v706_v14 = vmul.f32 1.442695, %v698_v55  ;;  %2521 = vmatmul.msk.f32.gmra.mxu2 %vm507_vm1, %v1332_v43  ;;  %vm1249_vm6 = vweird.f32 %v2593_v12  ;;  %v1269_v43 = vand.u32 2147483648, %v1180_v9 }
 0x182   : > { %v666_v16 = vpop.f32.mrf.mxu3  ;;  %vm1250_vm1 = vmor %vm1248_vm7, %vm1249_vm6  ;;  %vm1268_vm12 = vcmp.eq.f32.partialorder %v1267_v46, 8.507059e+37 }
 0x183   : > { %v1245_v18 = vsub.f32 1.0, %v1244_v60  ;;  %2598 = vpow2.f32 %v706_v14  ;;  %v667_v19 = vadd.f32 %v666_v16, %v3214_v11  ;;  %v1270_v62 = vor.u32 1.1754944e-38, %v1269_v43 }
 0x185   : > { %v1246_v22 = vmul.f32 %v2593_v12, %v1245_v18  ;;  %v691_v17 = vadd.f32 %v3219_v56, %v667_v19  ;;  %v2595_v24 = vpop.eup %2594 }
 0x186   : > { %v2597_v28 = vpop.eup %2596  ;;  %v3301_v30 = vadd.f32 1.0, %v2595_v24 }
 0x187   : > { %v1247_v25 = vadd.f32 %v2593_v12, %v1246_v22  ;;  %v699_v27 = vsub.f32 0.0, %v691_v17  ;;  %2506 = vmatmul.msk.f32.gmra.mxu3 %vm359_vm0, %v2490_v21  ;;  %v1259_v35 = vmul.f32 %v2597_v28, %v1180_v9  ;;  %vm1264_vm9 = vweird.f32 %v2597_v28 }
 0x188   : > { %2600 = vrcp.f32 %v3301_v30  ;;  %vm1265_vm11 = vmor %vm1263_vm10, %vm1264_vm9  ;;  %v1284_v1 = vand.u32 2147483648, %v3301_v30  ;;  %v1282_v6 = vand.u32 2147483647, %v3301_v30  ;;  %vm1278_vm14 = vweird.f32 %v3301_v30 }
 0x189   : > { %v2599_v11 = vpop.eup %2598  ;;  %v1251_v34 = vsel %vm1250_vm1, %v2593_v12, %v1247_v25  ;;  %v708_v33 = vmul.f32 1.442695, %v699_v27  ;;  %v1260_v39 = vsub.f32 1.0, %v1259_v35  ;;  %v2493_v25 = vld [vmem:[%s2961_s28 + $0xe0] sm:$0xff] }
 0x18a   : > { %v1256_v49 = vsel %vm1253_vm8, %v1255_v29, %v1251_v34  ;;  %v669_v38 = vpop.f32.mrf.mxu3  ;;  %v3306_v42 = vadd.f32 1.0, %v2599_v11  ;;  %v1285_v32 = vor.u32 1.1754944e-38, %v1284_v1  ;;  %vm1283_vm3 = vcmp.eq.f32.partialorder %v1282_v6, 8.507059e+37  ;;  %v3342_v34 = vpop.f32.mrf.mxu2  ;;  %v2495_v6 = vld [vmem:[%s2961_s28 + $0xf0] sm:$0xff] }
 0x18b   : > { %2443 = vst.msk [vmem:[%s3262_s30 + $0x60] sm:$0xff] %vm850_vm4, %v1256_v49  ;;  %2602 = vpow2.f32 %v708_v33  ;;  %v670_v41 = vadd.f32 %v669_v38, %v3228_v15  ;;  %v1261_v45 = vmul.f32 %v2597_v28, %v1260_v39 }
 0x18c   : > { %2604 = vrcp.f32 %v3306_v42  ;;  %v739_v12 = vand.u32 2147483647, %v3306_v42  ;;  %vm735_vm5 = vweird.f32 %v3306_v42 }
 0x18d   : > { %v692_v47 = vadd.f32 %v3219_v56, %v670_v41  ;;  %v1262_v26 = vadd.f32 %v2597_v28, %v1261_v45 }
 0x18e   : > { %v2601_v48 = vpop.eup %2600  ;;  %vm740_vm7 = vcmp.eq.f32.partialorder %v739_v12, 8.507059e+37 }
 0x18f   : > { %2507 = vmatmul.msk.f32.gmra.mxu3 %vm359_vm0, %v2491_v44  ;;  %v700_v50 = vsub.f32 0.0, %v692_v47  ;;  %v1266_v15 = vsel %vm1265_vm11, %v2597_v28, %v1262_v26  ;;  %v1274_v53 = vmul.f32 %v2601_v48, %v3301_v30  ;;  %vm1279_vm13 = vweird.f32 %v2601_v48  ;;  %v2494_v47 = vld [vmem:[%s2961_s28 + $0xe8] sm:$0xff] }
 0x190   : > { %v1271_v54 = vsel %vm1268_vm12, %v1270_v62, %v1266_v15  ;;  %vm1280_vm15 = vmor %vm1278_vm14, %vm1279_vm13 }
 0x191   : > { %v2603_v51 = vpop.eup %2602  ;;  %v710_v58 = vmul.f32 1.442695, %v700_v50  ;;  %2444 = vst.msk [vmem:[%s3262_s30 + $0x68] sm:$0xff] %vm850_vm4, %v1271_v54  ;;  %v1275_v0 = vsub.f32 1.0, %v1274_v53 }
 0x192   : > { %v3314_v57 = vadd.f32 1.0, %v2603_v51  ;;  %v672_v61 = vpop.f32.mrf.mxu3  ;;  %v2605_v63 = vpop.eup %2604 }
 0x193   : > { %v673_v2 = vadd.f32 %v672_v61, %v3237_v40  ;;  %v731_v3 = vmul.f32 %v2605_v63, %v3306_v42  ;;  %v1276_v5 = vmul.f32 %v2601_v48, %v1275_v0  ;;  %v741_v40 = vand.u32 2147483648, %v3306_v42  ;;  %v3352_v51 = vpop.f32.mrf.mxu2 }
 0x194   : > { %2606 = vrcp.f32 %v3314_v57  ;;  %vm736_vm2 = vweird.f32 %v2605_v63  ;;  %v754_v30 = vand.u32 2147483647, %v3314_v57  ;;  %v756_v11 = vand.u32 2147483648, %v3314_v57 }
 0x195   : > { %2608 = vpow2.f32 %v710_v58  ;;  %v732_v7 = vsub.f32 1.0, %v731_v3  ;;  %v693_v31 = vadd.f32 %v3219_v56, %v673_v2  ;;  %v1277_v10 = vadd.f32 %v2601_v48, %v1276_v5  ;;  %vm737_vm6 = vmor %vm735_vm5, %vm736_vm2  ;;  %v3357_v3 = vpop.f32.mrf.mxu1 }
 0x196   : > { %v742_v21 = vor.u32 1.1754944e-38, %v741_v40  ;;  %vm750_vm8 = vweird.f32 %v3314_v57  ;;  %vm755_vm10 = vcmp.eq.f32.partialorder %v754_v30, 8.507059e+37  ;;  %v757_v39 = vor.u32 1.1754944e-38, %v756_v11 }
 0x197   : > { %2508 = vmatmul.msk.f32.gmra.mxu3 %vm359_vm0, %v2492_v4  ;;  %v733_v55 = vmul.f32 %v2605_v63, %v732_v7  ;;  %v701_v59 = vsub.f32 0.0, %v693_v31  ;;  %v1281_v9 = vsel %vm1280_vm15, %v2601_v48, %v1277_v10 }
 0x198   : > { %v1286_v14 = vsel %vm1283_vm3, %v1285_v32, %v1281_v9 }
 0x199   : > { %v734_v16 = vadd.f32 %v2605_v63, %v733_v55  ;;  %v712_v18 = vmul.f32 1.442695, %v701_v59  ;;  %2445 = vst.msk [vmem:[%s3262_s30 + $0x70] sm:$0xff] %vm850_vm4, %v1286_v14 }
 0x19a   : > { %v2607_v60 = vpop.eup %2606  ;;  %v675_v19 = vpop.f32.mrf.mxu3 }
 0x19b   : > { %v2609_v20 = vpop.eup %2608  ;;  %v746_v22 = vmul.f32 %v2607_v60, %v3314_v57  ;;  %v676_v23 = vadd.f32 %v675_v19, %v3246_v37  ;;  %v738_v17 = vsel %vm737_vm6, %v2605_v63, %v734_v16  ;;  %2610 = vpow2.f32 %v712_v18  ;;  %v3354_v57 = vpop.f32.mrf.mxu0 }
 0x19c   : > { %v724_v24 = vadd.f32 1.0, %v2609_v20  ;;  %v743_v27 = vsel %vm740_vm7, %v742_v21, %v738_v17  ;;  %vm751_vm1 = vweird.f32 %v2607_v60 }
 0x19d   : > { %v747_v28 = vsub.f32 1.0, %v746_v22  ;;  %v694_v29 = vadd.f32 %v3219_v56, %v676_v23  ;;  %851 = vst.msk [vmem:[%s3262_s30] sm:$0xff] %vm850_vm4, %v743_v27  ;;  %vm752_vm9 = vmor %vm750_vm8, %vm751_vm1 }
 0x19e   : > { %2612 = vrcp.f32 %v724_v24  ;;  %v771_v50 = vand.u32 2147483648, %v724_v24  ;;  %vm765_vm12 = vweird.f32 %v724_v24 }
 0x19f   : > { %v748_v35 = vmul.f32 %v2607_v60, %v747_v28  ;;  %v702_v37 = vsub.f32 0.0, %v694_v29  ;;  %2509 = vmatmul.msk.f32.gmra.mxu3 %vm359_vm0, %v2493_v25  ;;  %v3371_v29 = vpop.f32.mrf.mxu1 }
 0x1a0   : > { %v772_v4 = vor.u32 1.1754944e-38, %v771_v50 }
 0x1a1   : > { %v749_v33 = vadd.f32 %v2607_v60, %v748_v35  ;;  %v714_v49 = vmul.f32 1.442695, %v702_v37  ;;  %v2611_v38 = vpop.eup %2610 }
 0x1a2   : > { %v678_v42 = vpop.f32.mrf.mxu3  ;;  %v725_v41 = vadd.f32 1.0, %v2611_v38 }
 0x1a3   : > { %v753_v43 = vsel %vm752_vm9, %v2607_v60, %v749_v33  ;;  %2614 = vpow2.f32 %v714_v49  ;;  %v679_v44 = vadd.f32 %v678_v42, %v3255_v52  ;;  %v769_v52 = vand.u32 2147483647, %v724_v24  ;;  %v3364_v60 = vpop.f32.mrf.mxu2  ;;  %v3367_v22 = vpop.f32.mrf.mxu0 }
 0x1a4   : > { %v2613_v45 = vpop.eup %2612  ;;  %v758_v46 = vsel %vm755_vm10, %v757_v39, %v753_v43  ;;  %2616 = vrcp.f32 %v725_v41  ;;  %v786_v40 = vand.u32 2147483648, %v725_v41  ;;  %v784_v55 = vand.u32 2147483647, %v725_v41 }
 0x1a5   : > { %852 = vst.msk [vmem:[%s3262_s30 + $0x8] sm:$0xff] %vm850_vm4, %v758_v46  ;;  %v761_v26 = vmul.f32 %v2613_v45, %v724_v24  ;;  %v695_v48 = vadd.f32 %v3219_v56, %v679_v44  ;;  %vm766_vm11 = vweird.f32 %v2613_v45  ;;  %vm770_vm14 = vcmp.eq.f32.partialorder %v769_v52, 8.507059e+37  ;;  %v2496_v24 = vld [vmem:[%s2961_s28 + $0xf8] sm:$0xff] }
 0x1a6   : > { %vm767_vm13 = vmor %vm765_vm12, %vm766_vm11  ;;  %vm780_vm2 = vweird.f32 %v725_v41  ;;  %v787_v19 = vor.u32 1.1754944e-38, %v786_v40  ;;  %vm785_vm5 = vcmp.eq.f32.partialorder %v784_v55, 8.507059e+37 }
 0x1a7   : > { %v762_v62 = vsub.f32 1.0, %v761_v26  ;;  %2510 = vmatmul.msk.f32.gmra.mxu3 %vm359_vm0, %v2494_v47  ;;  %v703_v15 = vsub.f32 0.0, %v695_v48  ;;  %v3384_v50 = vpop.f32.mrf.mxu1 }
 0x1a9   : > { %v2615_v53 = vpop.eup %2614  ;;  %v763_v54 = vmul.f32 %v2613_v45, %v762_v62  ;;  %v716_v61 = vmul.f32 1.442695, %v703_v15 }
 0x1aa   : > { %v726_v58 = vadd.f32 1.0, %v2615_v53  ;;  %v681_v63 = vpop.f32.mrf.mxu3  ;;  %v2617_v0 = vpop.eup %2616 }
 0x1ab   : > { %v764_v1 = vadd.f32 %v2613_v45, %v763_v54  ;;  %v682_v2 = vadd.f32 %v681_v63, %v3272_v13  ;;  %v776_v5 = vmul.f32 %v2617_v0, %v725_v41  ;;  %vm781_vm15 = vweird.f32 %v2617_v0  ;;  %v3377_v46 = vpop.f32.mrf.mxu2  ;;  %v3381_v26 = vpop.f32.mrf.mxu0 }
 0x1ac   : > { %2618 = vrcp.f32 %v726_v58  ;;  %vm782_vm3 = vmor %vm780_vm2, %vm781_vm15  ;;  %v799_v30 = vand.u32 2147483647, %v726_v58  ;;  %v801_v11 = vand.u32 2147483648, %v726_v58  ;;  %vm795_vm7 = vweird.f32 %v726_v58 }
 0x1ad   : > { %v768_v7 = vsel %vm767_vm13, %v2613_v45, %v764_v1  ;;  %2620 = vpow2.f32 %v716_v61  ;;  %v777_v10 = vsub.f32 1.0, %v776_v5  ;;  %v696_v32 = vadd.f32 %v3219_v56, %v682_v2 }
 0x1ae   : > { %v773_v31 = vsel %vm770_vm14, %v772_v4, %v768_v7  ;;  %vm800_vm8 = vcmp.eq.f32.partialorder %v799_v30, 8.507059e+37  ;;  %v802_v38 = vor.u32 1.1754944e-38, %v801_v11 }
 0x1af   : > { %853 = vst.msk [vmem:[%s3262_s30 + $0x10] sm:$0xff] %vm850_vm4, %v773_v31  ;;  %2511 = vmatmul.msk.f32.gmra.mxu3 %vm359_vm0, %v2495_v6  ;;  %v778_v13 = vmul.f32 %v2617_v0, %v777_v10  ;;  %v704_v12 = vsub.f32 0.0, %v696_v32 }
 0x1b1   : > { %v779_v9 = vadd.f32 %v2617_v0, %v778_v13  ;;  %v718_v14 = vmul.f32 1.442695, %v704_v12 }
 0x1b2   : > { %v2619_v59 = vpop.eup %2618  ;;  %v684_v16 = vpop.f32.mrf.mxu3 }
 0x1b3   : > { %v2621_v18 = vpop.eup %2620  ;;  %v791_v20 = vmul.f32 %v2619_v59, %v726_v58  ;;  %v685_v21 = vadd.f32 %v684_v16, %v3281_v36  ;;  %v783_v23 = vsel %vm782_vm3, %v2617_v0, %v779_v9  ;;  %2622 = vpow2.f32 %v718_v14  ;;  %v3388_v31 = vpop.f32.mrf.mxu2 }
 0x1b4   : > { %v727_v17 = vadd.f32 1.0, %v2621_v18  ;;  %v788_v25 = vsel %vm785_vm5, %v787_v19, %v783_v23  ;;  %vm796_vm6 = vweird.f32 %v2619_v59  ;;  %v3393_v13 = vpop.f32.mrf.mxu0  ;;  %v3396_v9 = vpop.f32.mrf.mxu1 }
 0x1b5   : > { %v792_v27 = vsub.f32 1.0, %v791_v20  ;;  %v697_v28 = vadd.f32 %v3219_v56, %v685_v21  ;;  %854 = vst.msk [vmem:[%s3262_s30 + $0x18] sm:$0xff] %vm850_vm4, %v788_v25  ;;  %vm797_vm1 = vmor %vm795_vm7, %vm796_vm6 }
 0x1b6   : > { %2624 = vrcp.f32 %v727_v17  ;;  %v816_v15 = vand.u32 2147483648, %v727_v17  ;;  %v814_v52 = vand.u32 2147483647, %v727_v17  ;;  %vm810_vm9 = vweird.f32 %v727_v17 }
 0x1b7   : > { %v793_v35 = vmul.f32 %v2619_v59, %v792_v27  ;;  %v705_v36 = vsub.f32 0.0, %v697_v28  ;;  %2512 = vmatmul.msk.f32.gmra.mxu3 %vm359_vm0, %v2496_v24 }
 0x1b8   : > { %vm815_vm11 = vcmp.eq.f32.partialorder %v814_v52, 8.507059e+37 }
 0x1b9   : > { %v794_v37 = vadd.f32 %v2619_v59, %v793_v35  ;;  %v720_v33 = vmul.f32 1.442695, %v705_v36  ;;  %v2623_v49 = vpop.eup %2622 }
 0x1ba   : > { %v1057_v39 = vpop.f32.mrf.mxu3  ;;  %v728_v43 = vadd.f32 1.0, %v2623_v49 }
 0x1bb   : > { %v798_v42 = vsel %vm797_vm1, %v2619_v59, %v794_v37  ;;  %2626 = vpow2.f32 %v720_v33  ;;  %v1058_v41 = vadd.f32 %v1057_v39, %v3321_v8  ;;  %v1453_v37 = vpop.f32.mrf.mxu2 }
 0x1bc   : > { %v2625_v44 = vpop.eup %2624  ;;  %v803_v45 = vsel %vm800_vm8, %v802_v38, %v798_v42  ;;  %2628 = vrcp.f32 %v728_v43  ;;  %v831_v40 = vand.u32 2147483648, %v728_v43  ;;  %v829_v55 = vand.u32 2147483647, %v728_v43  ;;  %v3403_v49 = vpop.f32.mrf.mxu0 }
 0x1bd   : > { %855 = vst.msk [vmem:[%s3262_s30 + $0x20] sm:$0xff] %vm850_vm4, %v803_v45  ;;  %v806_v47 = vmul.f32 %v2625_v44, %v727_v17  ;;  %v1142_v48 = vadd.f32 %v3342_v34, %v1058_v41  ;;  %vm811_vm0 = vweird.f32 %v2625_v44  ;;  %v817_v34 = vor.u32 1.1754944e-38, %v816_v15 }
 0x1be   : > { %vm812_vm10 = vmor %vm810_vm9, %vm811_vm0  ;;  %vm825_vm13 = vweird.f32 %v728_v43  ;;  %vm830_vm15 = vcmp.eq.f32.partialorder %v829_v55, 8.507059e+37 }
 0x1bf   : > { %v807_v62 = vsub.f32 1.0, %v806_v47  ;;  %v1150_v53 = vadd.f32 %v3219_v56, %v1142_v48 }
 0x1c1   : > { %v2627_v54 = vpop.eup %2626  ;;  %v808_v8 = vmul.f32 %v2625_v44, %v807_v62  ;;  %v1158_v61 = vsub.f32 0.0, %v1150_v53 }
 0x1c2   : > { %v729_v58 = vadd.f32 1.0, %v2627_v54  ;;  %v1376_v63 = vpop.f32.mrf.mxu3  ;;  %v2629_v0 = vpop.eup %2628 }
 0x1c3   : > { %v809_v1 = vadd.f32 %v2625_v44, %v808_v8  ;;  %v1442_v2 = vadd.f32 %v3352_v51, %v1376_v63  ;;  %v821_v4 = vmul.f32 %v2629_v0, %v728_v43  ;;  %v1173_v6 = vmul.f32 1.442695, %v1158_v61  ;;  %v3412_v8 = vpop.f32.mrf.mxu2 }
 0x1c4   : > { %2630 = vrcp.f32 %v729_v58  ;;  %vm826_vm12 = vweird.f32 %v2629_v0  ;;  %v846_v28 = vand.u32 2147483648, %v729_v58  ;;  %v844_v35 = vand.u32 2147483647, %v729_v58 }
 0x1c5   : > { %v813_v5 = vsel %vm812_vm10, %v2625_v44, %v809_v1  ;;  %v822_v10 = vsub.f32 1.0, %v821_v4  ;;  %v1540_v32 = vadd.f32 %v3354_v57, %v1442_v2  ;;  %2632 = vpow2.f32 %v1173_v6  ;;  %vm827_vm14 = vmor %vm825_vm13, %vm826_vm12  ;;  %v3406_v44 = vpop.f32.mrf.mxu1  ;;  %v3415_v2 = vpop.f32.mrf.mxu0 }
 0x1c6   : > { %v818_v7 = vsel %vm815_vm11, %v817_v34, %v813_v5  ;;  %v832_v57 = vor.u32 1.1754944e-38, %v831_v40  ;;  %vm840_vm3 = vweird.f32 %v729_v58  ;;  %vm845_vm6 = vcmp.eq.f32.partialorder %v844_v35, 8.507059e+37  ;;  %v3427_v35 = vld [vmem:[%s3510_s6] ss:$0 sm:$0xff] }
 0x1c7   : > { %856 = vst.msk [vmem:[%s3262_s30 + $0x28] sm:$0xff] %vm850_vm4, %v818_v7  ;;  %v823_v51 = vmul.f32 %v2629_v0, %v822_v10  ;;  %v1548_v12 = vadd.f32 %v3219_v56, %v1540_v32 }
 0x1c9   : > { %v824_v14 = vadd.f32 %v2629_v0, %v823_v51  ;;  %v1556_v16 = vsub.f32 0.0, %v1548_v12 }
 0x1ca   : > { %v2631_v59 = vpop.eup %2630  ;;  %v1379_v18 = vpop.f32.mrf.mxu3 }
 0x1cb   : > { %v836_v19 = vmul.f32 %v2631_v59, %v729_v58  ;;  %v1445_v20 = vadd.f32 %v3364_v60, %v1379_v18  ;;  %v828_v21 = vsel %vm827_vm14, %v2629_v0, %v824_v14  ;;  %v1564_v23 = vmul.f32 1.442695, %v1556_v16  ;;  %v2633_v17 = vpop.eup %2632 }
 0x1cc   : > { %v833_v24 = vsel %vm830_vm15, %v832_v57, %v828_v21  ;;  %v1182_v30 = vadd.f32 1.0, %v2633_v17  ;;  %vm841_vm2 = vweird.f32 %v2631_v59 }
 0x1cd   : > { %v837_v25 = vsub.f32 1.0, %v836_v19  ;;  %v1541_v27 = vadd.f32 %v3367_v22, %v1445_v20  ;;  %857 = vst.msk [vmem:[%s3262_s30 + $0x30] sm:$0xff] %vm850_vm4, %v833_v24  ;;  %2634 = vpow2.f32 %v1564_v23  ;;  %vm842_vm5 = vmor %vm840_vm3, %vm841_vm2  ;;  %v847_v22 = vor.u32 1.1754944e-38, %v846_v28  ;;  %v3418_v7 = vpop.f32.mrf.mxu1  ;;  %v1459_v19 = vpop.f32.mrf.mxu2 }
 0x1ce   : > { %2636 = vrcp.f32 %v1182_v30  ;;  %v1299_v52 = vand.u32 2147483648, %v1182_v30  ;;  %v1297_v0 = vand.u32 2147483647, %v1182_v30  ;;  %vm1293_vm1 = vweird.f32 %v1182_v30 }
 0x1cf   : > { %v838_v11 = vmul.f32 %v2631_v59, %v837_v25  ;;  %v1549_v36 = vadd.f32 %v3219_v56, %v1541_v27  ;;  %v1534_v25 = vpop.f32.mrf.mxu0 }
 0x1d0   : > { %v1300_v10 = vor.u32 1.1754944e-38, %v1299_v52  ;;  %vm1298_vm0 = vcmp.eq.f32.partialorder %v1297_v0, 8.507059e+37 }
 0x1d1   : > { %v839_v60 = vadd.f32 %v2631_v59, %v838_v11  ;;  %v1557_v33 = vsub.f32 0.0, %v1549_v36 }
 0x1d2   : > { %v1382_v38 = vpop.f32.mrf.mxu3 }
 0x1d3   : > { %v843_v39 = vsel %vm842_vm5, %v2631_v59, %v839_v60  ;;  %v1566_v42 = vmul.f32 1.442695, %v1557_v33  ;;  %v1448_v43 = vadd.f32 %v3377_v46, %v1382_v38  ;;  %v2635_v41 = vpop.eup %2634 }
 0x1d4   : > { %v848_v45 = vsel %vm845_vm6, %v847_v22, %v843_v39  ;;  %v1580_v47 = vadd.f32 1.0, %v2635_v41  ;;  %v2637_v62 = vpop.eup %2636 }
 0x1d5   : > { %858 = vst.msk [vmem:[%s3262_s30 + $0x38] sm:$0xff] %vm850_vm4, %v848_v45  ;;  %2638 = vpow2.f32 %v1566_v42  ;;  %v1542_v48 = vadd.f32 %v3381_v26, %v1448_v43  ;;  %v1289_v15 = vmul.f32 %v2637_v62, %v1182_v30  ;;  %vm1294_vm7 = vweird.f32 %v2637_v62 }
 0x1d6   : > { %2640 = vrcp.f32 %v1580_v47  ;;  %vm1295_vm8 = vmor %vm1293_vm1, %vm1294_vm7  ;;  %v1599_v12 = vand.u32 2147483648, %v1580_v47  ;;  %v1597_v14 = vand.u32 2147483647, %v1580_v47  ;;  %vm1593_vm10 = vweird.f32 %v1580_v47 }
 0x1d7   : > { %v1550_v53 = vadd.f32 %v3219_v56, %v1542_v48  ;;  %v1290_v54 = vsub.f32 1.0, %v1289_v15 }
 0x1d8   : > { %v1600_v17 = vor.u32 1.1754944e-38, %v1599_v12  ;;  %vm1598_vm12 = vcmp.eq.f32.partialorder %v1597_v14, 8.507059e+37 }
 0x1d9   : > { %v1558_v46 = vsub.f32 0.0, %v1550_v53  ;;  %v1291_v63 = vmul.f32 %v2637_v62, %v1290_v54  ;;  %v1462_v53 = vpop.f32.mrf.mxu2 }
 0x1da   : > { %v1385_v58 = vpop.f32.mrf.mxu3 }
 0x1db   : > { %v2639_v61 = vpop.eup %2638  ;;  %v1451_v1 = vadd.f32 %v3388_v31, %v1385_v58  ;;  %v1568_v34 = vmul.f32 1.442695, %v1558_v46  ;;  %v1292_v5 = vadd.f32 %v2637_v62, %v1291_v63  ;;  %v1537_v46 = vpop.f32.mrf.mxu0 }
 0x1dc   : > { %v1581_v26 = vadd.f32 1.0, %v2639_v61  ;;  %v2641_v4 = vpop.eup %2640 }
 0x1dd   : > { %v1543_v6 = vadd.f32 %v3393_v13, %v1451_v1  ;;  %v1589_v32 = vmul.f32 %v2641_v4, %v1580_v47  ;;  %v1296_v40 = vsel %vm1295_vm8, %v2637_v62, %v1292_v5  ;;  %vm1594_vm9 = vweird.f32 %v2641_v4 }
 0x1de   : > { %2642 = vrcp.f32 %v1581_v26  ;;  %v1301_v31 = vsel %vm1298_vm0, %v1300_v10, %v1296_v40  ;;  %vm1595_vm11 = vmor %vm1593_vm10, %vm1594_vm9  ;;  %v1612_v60 = vand.u32 2147483647, %v1581_v26  ;;  %v1614_v33 = vand.u32 2147483648, %v1581_v26 }
 0x1df   : > { %2644 = vpow2.f32 %v1568_v34  ;;  %v1590_v51 = vsub.f32 1.0, %v1589_v32  ;;  %v1551_v55 = vadd.f32 %v3219_v56, %v1543_v6  ;;  %2446 = vst.msk [vmem:[%s3262_s30 + $0x78] sm:$0xff] %vm850_vm4, %v1301_v31  ;;  %vm1608_vm14 = vweird.f32 %v1581_v26 }
 0x1e0   : > { %vm1613_vm2 = vcmp.eq.f32.partialorder %v1612_v60, 8.507059e+37  ;;  %v1615_v45 = vor.u32 1.1754944e-38, %v1614_v33 }
 0x1e1   : > { %v1591_v59 = vmul.f32 %v2641_v4, %v1590_v51  ;;  %v1559_v13 = vsub.f32 0.0, %v1551_v55  ;;  %v1928_v12 = vpop.f32.mrf.mxu2 }
 0x1e2   : > { %v1388_v16 = vpop.f32.mrf.mxu3 }
 0x1e3   : > { %v1454_v18 = vadd.f32 %v1453_v37, %v1388_v16  ;;  %v1592_v20 = vadd.f32 %v2641_v4, %v1591_v59  ;;  %v1570_v21 = vmul.f32 1.442695, %v1559_v13  ;;  %v3430_v37 = vpop.f32.mrf.mxu1 }
 0x1e4   : > { %v2643_v57 = vpop.eup %2642 }
 0x1e5   : > { %v2645_v23 = vpop.eup %2644  ;;  %v1604_v24 = vmul.f32 %v2643_v57, %v1581_v26  ;;  %v1544_v56 = vadd.f32 %v3403_v49, %v1454_v18  ;;  %v1596_v27 = vsel %vm1595_vm11, %v2641_v4, %v1592_v20  ;;  %2646 = vpow2.f32 %v1570_v21  ;;  %v2019_v18 = vpop.f32.mrf.mxu0 }
 0x1e6   : > { %v1582_v28 = vadd.f32 1.0, %v2645_v23  ;;  %v1601_v30 = vsel %vm1598_vm12, %v1600_v17, %v1596_v27  ;;  %vm1609_vm13 = vweird.f32 %v2643_v57 }
 0x1e7   : > { %v1605_v11 = vsub.f32 1.0, %v1604_v24  ;;  %v1552_v36 = vadd.f32 %v3427_v35, %v1544_v56  ;;  %2481 = vst.msk [vmem:[%s3262_s30 + $0x80] sm:$0xff] %vm850_vm4, %v1601_v30  ;;  %vm1610_vm15 = vmor %vm1608_vm14, %vm1609_vm13 }
 0x1e8   : > { %2648 = vrcp.f32 %v1582_v28  ;;  %v1629_v63 = vand.u32 2147483648, %v1582_v28  ;;  %vm1623_vm5 = vweird.f32 %v1582_v28 }
 0x1e9   : > { %v1606_v49 = vmul.f32 %v2643_v57, %v1605_v11  ;;  %v1560_v22 = vsub.f32 0.0, %v1552_v36 }
 0x1ea   : > { %v1391_v38 = vpop.f32.mrf.mxu3  ;;  %v1630_v31 = vor.u32 1.1754944e-38, %v1629_v63 }
 0x1eb   : > { %v1607_v39 = vadd.f32 %v2643_v57, %v1606_v49  ;;  %v1572_v42 = vmul.f32 1.442695, %v1560_v22  ;;  %v1457_v43 = vadd.f32 %v3412_v8, %v1391_v38  ;;  %v2647_v41 = vpop.eup %2646  ;;  %v3439_v61 = vpop.f32.mrf.mxu1 }
 0x1ec   : > { %v1583_v48 = vadd.f32 1.0, %v2647_v41  ;;  %v1931_v41 = vpop.f32.mrf.mxu2 }
 0x1ed   : > { %v1611_v47 = vsel %vm1610_vm15, %v2643_v57, %v1607_v39  ;;  %2650 = vpow2.f32 %v1572_v42  ;;  %v1545_v62 = vadd.f32 %v3415_v2, %v1457_v43  ;;  %v1627_v2 = vand.u32 2147483647, %v1582_v28 }
 0x1ee   : > { %v2649_v15 = vpop.eup %2648  ;;  %v1616_v54 = vsel %vm1613_vm2, %v1615_v45, %v1611_v47  ;;  %2652 = vrcp.f32 %v1583_v48  ;;  %v1644_v16 = vand.u32 2147483648, %v1583_v48  ;;  %vm1638_vm8 = vweird.f32 %v1583_v48 }
 0x1ef   : > { %2482 = vst.msk [vmem:[%s3262_s30 + $0x88] sm:$0xff] %vm850_vm4, %v1616_v54  ;;  %v1619_v52 = vmul.f32 %v2649_v15, %v1582_v28  ;;  %v1553_v58 = vadd.f32 %v3427_v35, %v1545_v62  ;;  %vm1624_vm3 = vweird.f32 %v2649_v15  ;;  %vm1628_vm7 = vcmp.eq.f32.partialorder %v1627_v2, 8.507059e+37 }
 0x1f0   : > { %vm1625_vm6 = vmor %vm1623_vm5, %vm1624_vm3  ;;  %v1645_v28 = vor.u32 1.1754944e-38, %v1644_v16 }
 0x1f1   : > { %v1620_v8 = vsub.f32 1.0, %v1619_v52  ;;  %v1561_v0 = vsub.f32 0.0, %v1553_v58 }
 0x1f2   : > { %v1394_v1 = vpop.f32.mrf.mxu3 }
 0x1f3   : > { %v2651_v26 = vpop.eup %2650  ;;  %v1621_v34 = vmul.f32 %v2649_v15, %v1620_v8  ;;  %v1460_v4 = vadd.f32 %v1459_v19, %v1394_v1  ;;  %v1574_v6 = vmul.f32 1.442695, %v1561_v0  ;;  %v1642_v19 = vand.u32 2147483647, %v1583_v48  ;;  %v2102_v24 = vpop.f32.mrf.mxu1 }
 0x1f4   : > { %v1584_v5 = vadd.f32 1.0, %v2651_v26  ;;  %v2653_v10 = vpop.eup %2652 }
 0x1f5   : > { %v1622_v32 = vadd.f32 %v2649_v15, %v1621_v34  ;;  %v1546_v40 = vadd.f32 %v1534_v25, %v1460_v4  ;;  %v1634_v51 = vmul.f32 %v2653_v10, %v1583_v48  ;;  %vm1639_vm1 = vweird.f32 %v2653_v10 }
 0x1f6   : > { %2654 = vrcp.f32 %v1584_v5  ;;  %vm1640_vm0 = vmor %vm1638_vm8, %vm1639_vm1  ;;  %vm1643_vm9 = vcmp.eq.f32.partialorder %v1642_v19, 8.507059e+37  ;;  %v1657_v38 = vand.u32 2147483647, %v1584_v5  ;;  %v1659_v39 = vand.u32 2147483648, %v1584_v5 }
 0x1f7   : > { %v1626_v55 = vsel %vm1625_vm6, %v2649_v15, %v1622_v32  ;;  %2656 = vpow2.f32 %v1574_v6  ;;  %v1635_v14 = vsub.f32 1.0, %v1634_v51  ;;  %v1554_v13 = vadd.f32 %v3427_v35, %v1546_v40  ;;  %v1934_v40 = vpop.f32.mrf.mxu2 }
 0x1f8   : > { %v1631_v59 = vsel %vm1628_vm7, %v1630_v31, %v1626_v55  ;;  %vm1653_vm11 = vweird.f32 %v1584_v5  ;;  %vm1658_vm13 = vcmp.eq.f32.partialorder %v1657_v38, 8.507059e+37  ;;  %v1660_v54 = vor.u32 1.1754944e-38, %v1659_v39 }
 0x1f9   : > { %2483 = vst.msk [vmem:[%s3262_s30 + $0x90] sm:$0xff] %vm850_vm4, %v1631_v59  ;;  %v1636_v57 = vmul.f32 %v2653_v10, %v1635_v14  ;;  %v1562_v20 = vsub.f32 0.0, %v1554_v13 }
 0x1fa   : > { %v1397_v21 = vpop.f32.mrf.mxu3 }
 0x1fb   : > { %v1463_v23 = vadd.f32 %v1462_v53, %v1397_v21  ;;  %v1637_v56 = vadd.f32 %v2653_v10, %v1636_v57  ;;  %v1576_v25 = vmul.f32 1.442695, %v1562_v20  ;;  %v2022_v53 = vpop.f32.mrf.mxu0  ;;  %v2105_v63 = vpop.f32.mrf.mxu1 }
 0x1fc   : > { %v2655_v17 = vpop.eup %2654 }
 0x1fd   : > { %v2657_v27 = vpop.eup %2656  ;;  %v1649_v30 = vmul.f32 %v2655_v17, %v1584_v5  ;;  %v1547_v11 = vadd.f32 %v1537_v46, %v1463_v23  ;;  %v1641_v36 = vsel %vm1640_vm0, %v2653_v10, %v1637_v56  ;;  %2658 = vpow2.f32 %v1576_v25 }
 0x1fe   : > { %v1585_v60 = vadd.f32 1.0, %v2657_v27  ;;  %v1646_v33 = vsel %vm1643_vm9, %v1645_v28, %v1641_v36  ;;  %vm1654_vm10 = vweird.f32 %v2655_v17 }
 0x1ff   : > { %v1650_v49 = vsub.f32 1.0, %v1649_v30  ;;  %v1555_v22 = vadd.f32 %v3427_v35, %v1547_v11  ;;  %2484 = vst.msk [vmem:[%s3262_s30 + $0x98] sm:$0xff] %vm850_vm4, %v1646_v33  ;;  %vm1655_vm12 = vmor %vm1653_vm11, %vm1654_vm10 }
 0x200   : > { %2660 = vrcp.f32 %v1585_v60  ;;  %v1674_v2 = vand.u32 2147483648, %v1585_v60  ;;  %v1672_v10 = vand.u32 2147483647, %v1585_v60  ;;  %vm1668_vm15 = vweird.f32 %v1585_v60 }
 0x201   : > { %v1651_v42 = vmul.f32 %v2655_v17, %v1650_v49  ;;  %v1563_v43 = vsub.f32 0.0, %v1555_v22  ;;  %v1937_v22 = vpop.f32.mrf.mxu2 }
 0x202   : > { %v1853_v45 = vpop.f32.mrf.mxu3  ;;  %v1675_v13 = vor.u32 1.1754944e-38, %v1674_v2  ;;  %vm1673_vm3 = vcmp.eq.f32.partialorder %v1672_v10, 8.507059e+37 }
 0x203   : > { %v1652_v47 = vadd.f32 %v2655_v17, %v1651_v42  ;;  %v1578_v48 = vmul.f32 1.442695, %v1563_v43  ;;  %v1854_v62 = vadd.f32 %v1853_v45, %v3357_v3  ;;  %v2659_v15 = vpop.eup %2658  ;;  %v2025_v14 = vpop.f32.mrf.mxu0 }
 0x204   : > { %v1586_v46 = vadd.f32 1.0, %v2659_v15 }
 0x205   : > { %v1656_v52 = vsel %vm1655_vm12, %v2655_v17, %v1652_v47  ;;  %2662 = vpow2.f32 %v1578_v48  ;;  %v1952_v58 = vadd.f32 %v1928_v12, %v1854_v62 }
 0x206   : > { %v2661_v8 = vpop.eup %2660  ;;  %v1661_v0 = vsel %vm1658_vm13, %v1660_v54, %v1656_v52  ;;  %2664 = vrcp.f32 %v1586_v46  ;;  %v1689_v23 = vand.u32 2147483648, %v1586_v46  ;;  %v1687_v56 = vand.u32 2147483647, %v1586_v46 }
 0x207   : > { %2485 = vst.msk [vmem:[%s3262_s30 + $0xa0] sm:$0xff] %vm850_vm4, %v1661_v0  ;;  %v1664_v1 = vmul.f32 %v2661_v8, %v1585_v60  ;;  %v2043_v26 = vadd.f32 %v2019_v18, %v1952_v58  ;;  %vm1669_vm14 = vweird.f32 %v2661_v8  ;;  %vm1683_vm6 = vweird.f32 %v1586_v46 }
 0x208   : > { %vm1670_vm2 = vmor %vm1668_vm15, %vm1669_vm14  ;;  %v1690_v60 = vor.u32 1.1754944e-38, %v1689_v23  ;;  %vm1688_vm1 = vcmp.eq.f32.partialorder %v1687_v56, 8.507059e+37 }
 0x209   : > { %v1665_v34 = vsub.f32 1.0, %v1664_v1  ;;  %v2126_v3 = vadd.f32 %v2102_v24, %v2043_v26 }
 0x20a   : > { %v1856_v4 = vpop.f32.mrf.mxu3 }
 0x20b   : > { %v2663_v5 = vpop.eup %2662  ;;  %v1666_v6 = vmul.f32 %v2661_v8, %v1665_v34  ;;  %v1857_v32 = vadd.f32 %v1856_v4, %v3371_v29  ;;  %v2134_v51 = vadd.f32 %v3427_v35, %v2126_v3  ;;  %v2108_v29 = vpop.f32.mrf.mxu1 }
 0x20c   : > { %v3451_v31 = vadd.f32 1.0, %v2663_v5  ;;  %v2665_v55 = vpop.eup %2664  ;;  %v2028_v45 = vpop.f32.mrf.mxu0 }
 0x20d   : > { %v1667_v12 = vadd.f32 %v2661_v8, %v1666_v6  ;;  %v1953_v59 = vadd.f32 %v1931_v41, %v1857_v32  ;;  %v1679_v16 = vmul.f32 %v2665_v55, %v1586_v46  ;;  %v2142_v57 = vsub.f32 0.0, %v2134_v51  ;;  %v1940_v6 = vpop.f32.mrf.mxu2 }
 0x20e   : > { %2666 = vrcp.f32 %v3451_v31  ;;  %vm1684_vm5 = vweird.f32 %v2665_v55  ;;  %v1702_v15 = vand.u32 2147483647, %v3451_v31  ;;  %vm1698_vm0 = vweird.f32 %v3451_v31 }
 0x20f   : > { %v1671_v18 = vsel %vm1670_vm2, %v2661_v8, %v1667_v12  ;;  %v1680_v20 = vsub.f32 1.0, %v1679_v16  ;;  %v2044_v21 = vadd.f32 %v2022_v53, %v1953_v59  ;;  %v2150_v17 = vmul.f32 1.442695, %v2142_v57  ;;  %vm1685_vm7 = vmor %vm1683_vm6, %vm1684_vm5 }
 0x210   : > { %v1676_v19 = vsel %vm1673_vm3, %v1675_v13, %v1671_v18  ;;  %vm1703_vm10 = vcmp.eq.f32.partialorder %v1702_v15, 8.507059e+37 }
 0x211   : > { %2486 = vst.msk [vmem:[%s3262_s30 + $0xa8] sm:$0xff] %vm850_vm4, %v1676_v19  ;;  %v1681_v24 = vmul.f32 %v2665_v55, %v1680_v20  ;;  %v2127_v25 = vadd.f32 %v2105_v63, %v2044_v21  ;;  %2668 = vpow2.f32 %v2150_v17 }
 0x212   : > { %v1859_v27 = vpop.f32.mrf.mxu3 }
 0x213   : > { %v1860_v28 = vadd.f32 %v1859_v27, %v3384_v50  ;;  %v1682_v11 = vadd.f32 %v2665_v55, %v1681_v24  ;;  %v2135_v36 = vadd.f32 %v3427_v35, %v2127_v25  ;;  %v1704_v50 = vand.u32 2147483648, %v3451_v31  ;;  %v2111_v54 = vpop.f32.mrf.mxu1 }
 0x214   : > { %v2667_v30 = vpop.eup %2666 }
 0x215   : > { %v1694_v33 = vmul.f32 %v2667_v30, %v3451_v31  ;;  %v1954_v49 = vadd.f32 %v1934_v40, %v1860_v28  ;;  %v1686_v38 = vsel %vm1685_vm7, %v2665_v55, %v1682_v11  ;;  %v2143_v39 = vsub.f32 0.0, %v2135_v36  ;;  %v2031_v31 = vpop.f32.mrf.mxu0  ;;  %v1943_v56 = vpop.f32.mrf.mxu2 }
 0x216   : > { %v1691_v42 = vsel %vm1688_vm1, %v1690_v60, %v1686_v38  ;;  %vm1699_vm8 = vweird.f32 %v2667_v30  ;;  %v1705_v0 = vor.u32 1.1754944e-38, %v1704_v50 }
 0x217   : > { %v1695_v43 = vsub.f32 1.0, %v1694_v33  ;;  %v2045_v41 = vadd.f32 %v2025_v14, %v1954_v49  ;;  %2487 = vst.msk [vmem:[%s3262_s30 + $0xb0] sm:$0xff] %vm850_vm4, %v1691_v42  ;;  %v2152_v47 = vmul.f32 1.442695, %v2143_v39  ;;  %v2669_v48 = vpop.eup %2668  ;;  %vm1700_vm9 = vmor %vm1698_vm0, %vm1699_vm8 }
 0x218   : > { %v2166_v52 = vadd.f32 1.0, %v2669_v48 }
 0x219   : > { %v1696_v62 = vmul.f32 %v2667_v30, %v1695_v43  ;;  %v2128_v53 = vadd.f32 %v2108_v29, %v2045_v41  ;;  %2670 = vpow2.f32 %v2152_v47 }
 0x21a   : > { %v1862_v46 = vpop.f32.mrf.mxu3  ;;  %2672 = vrcp.f32 %v2166_v52  ;;  %v2185_v13 = vand.u32 2147483648, %v2166_v52  ;;  %v2183_v19 = vand.u32 2147483647, %v2166_v52  ;;  %vm2179_vm12 = vweird.f32 %v2166_v52 }
 0x21b   : > { %v1697_v58 = vadd.f32 %v2667_v30, %v1696_v62  ;;  %v2136_v8 = vadd.f32 %v3427_v35, %v2128_v53  ;;  %v1863_v63 = vadd.f32 %v1862_v46, %v3396_v9  ;;  %v2114_v55 = vpop.f32.mrf.mxu1 }
 0x21c   : > { %v2186_v25 = vor.u32 1.1754944e-38, %v2185_v13  ;;  %vm2184_vm14 = vcmp.eq.f32.partialorder %v2183_v19, 8.507059e+37 }
 0x21d   : > { %v1701_v1 = vsel %vm1700_vm9, %v2667_v30, %v1697_v58  ;;  %v2144_v26 = vsub.f32 0.0, %v2136_v8  ;;  %v1955_v34 = vadd.f32 %v1937_v22, %v1863_v63  ;;  %v2034_v30 = vpop.f32.mrf.mxu0 }
 0x21e   : > { %v1706_v2 = vsel %vm1703_vm10, %v1705_v0, %v1701_v1  ;;  %v1946_v0 = vpop.f32.mrf.mxu2 }
 0x21f   : > { %2488 = vst.msk [vmem:[%s3262_s30 + $0xb8] sm:$0xff] %vm850_vm4, %v1706_v2  ;;  %v2154_v3 = vmul.f32 1.442695, %v2144_v26  ;;  %v2046_v4 = vadd.f32 %v2028_v45, %v1955_v34  ;;  %v2671_v5 = vpop.eup %2670 }
 0x220   : > { %v2167_v10 = vadd.f32 1.0, %v2671_v5  ;;  %v2673_v40 = vpop.eup %2672 }
 0x221   : > { %2674 = vpow2.f32 %v2154_v3  ;;  %v2129_v32 = vadd.f32 %v2111_v54, %v2046_v4  ;;  %v2175_v51 = vmul.f32 %v2673_v40, %v2166_v52  ;;  %vm2180_vm11 = vweird.f32 %v2673_v40 }
 0x222   : > { %v1865_v9 = vpop.f32.mrf.mxu3  ;;  %2676 = vrcp.f32 %v2167_v10  ;;  %vm2181_vm13 = vmor %vm2179_vm12, %vm2180_vm11  ;;  %v2198_v49 = vand.u32 2147483647, %v2167_v10  ;;  %v2200_v22 = vand.u32 2147483648, %v2167_v10  ;;  %vm2194_vm2 = vweird.f32 %v2167_v10 }
 0x223   : > { %v2137_v12 = vadd.f32 %v3427_v35, %v2129_v32  ;;  %v1866_v59 = vadd.f32 %v1865_v9, %v3406_v44  ;;  %v2176_v14 = vsub.f32 1.0, %v2175_v51  ;;  %v2117_v38 = vpop.f32.mrf.mxu1 }
 0x224   : > { %vm2199_vm5 = vcmp.eq.f32.partialorder %v2198_v49, 8.507059e+37 }
 0x225   : > { %v2145_v16 = vsub.f32 0.0, %v2137_v12  ;;  %v1956_v18 = vadd.f32 %v1940_v6, %v1866_v59  ;;  %v2177_v29 = vmul.f32 %v2673_v40, %v2176_v14  ;;  %v2037_v4 = vpop.f32.mrf.mxu0 }
 0x227   : > { %v2675_v57 = vpop.eup %2674  ;;  %v2156_v21 = vmul.f32 1.442695, %v2145_v16  ;;  %v2047_v23 = vadd.f32 %v2031_v31, %v1956_v18  ;;  %v2178_v24 = vadd.f32 %v2673_v40, %v2177_v29 }
 0x228   : > { %v3471_v20 = vadd.f32 1.0, %v2675_v57  ;;  %v2677_v17 = vpop.eup %2676  ;;  %v1949_v57 = vpop.f32.mrf.mxu2 }
 0x229   : > { %v2190_v44 = vmul.f32 %v2677_v17, %v2167_v10  ;;  %v2182_v28 = vsel %vm2181_vm13, %v2673_v40, %v2178_v24  ;;  %v2130_v60 = vadd.f32 %v2114_v55, %v2047_v23  ;;  %vm2195_vm15 = vweird.f32 %v2677_v17 }
 0x22a   : > { %2678 = vrcp.f32 %v3471_v20  ;;  %v1868_v27 = vpop.f32.mrf.mxu3  ;;  %v2187_v11 = vsel %vm2184_vm14, %v2186_v25, %v2182_v28  ;;  %vm2196_vm3 = vmor %vm2194_vm2, %vm2195_vm15  ;;  %v2213_v1 = vand.u32 2147483647, %v3471_v20  ;;  %v2215_v26 = vand.u32 2147483648, %v3471_v20 }
 0x22b   : > { %2680 = vpow2.f32 %v2156_v21  ;;  %v2191_v36 = vsub.f32 1.0, %v2190_v44  ;;  %v1869_v33 = vadd.f32 %v1868_v27, %v3418_v7  ;;  %2540 = vst.msk [vmem:[%s3262_s30 + $0xc0] sm:$0xff] %vm850_vm4, %v2187_v11  ;;  %v2138_v42 = vadd.f32 %v3427_v35, %v2130_v60  ;;  %v2120_v10 = vpop.f32.mrf.mxu1 }
 0x22c   : > { %v2201_v7 = vor.u32 1.1754944e-38, %v2200_v22  ;;  %vm2209_vm7 = vweird.f32 %v3471_v20  ;;  %v2216_v32 = vor.u32 1.1754944e-38, %v2215_v26  ;;  %vm2214_vm8 = vcmp.eq.f32.partialorder %v2213_v1, 8.507059e+37 }
 0x22d   : > { %v2192_v39 = vmul.f32 %v2677_v17, %v2191_v36  ;;  %v1957_v43 = vadd.f32 %v1943_v56, %v1869_v33  ;;  %v2146_v50 = vsub.f32 0.0, %v2138_v42  ;;  %v2040_v56 = vpop.f32.mrf.mxu0 }
 0x22f   : > { %v2193_v45 = vadd.f32 %v2677_v17, %v2192_v39  ;;  %v2048_v47 = vadd.f32 %v2034_v30, %v1957_v43  ;;  %v2158_v54 = vmul.f32 1.442695, %v2146_v50 }
 0x230   : > { %v2679_v41 = vpop.eup %2678 }
 0x231   : > { %v2681_v48 = vpop.eup %2680  ;;  %v2205_v62 = vmul.f32 %v2679_v41, %v3471_v20  ;;  %v2197_v15 = vsel %vm2196_vm3, %v2677_v17, %v2193_v45  ;;  %v2131_v52 = vadd.f32 %v2117_v38, %v2048_v47  ;;  %vm2210_vm6 = vweird.f32 %v2679_v41 }
 0x232   : > { %v2169_v53 = vadd.f32 1.0, %v2681_v48  ;;  %v1871_v46 = vpop.f32.mrf.mxu3  ;;  %v2202_v58 = vsel %vm2199_vm5, %v2201_v7, %v2197_v15  ;;  %vm2211_vm1 = vmor %vm2209_vm7, %vm2210_vm6 }
 0x233   : > { %v2206_v8 = vsub.f32 1.0, %v2205_v62  ;;  %v1872_v63 = vadd.f32 %v1871_v46, %v3430_v37  ;;  %2541 = vst.msk [vmem:[%s3262_s30 + $0xc8] sm:$0xff] %vm850_vm4, %v2202_v58  ;;  %v2139_v2 = vadd.f32 %v3427_v35, %v2131_v52  ;;  %v2123_v28 = vpop.f32.mrf.mxu1 }
 0x234   : > { %2682 = vrcp.f32 %v2169_v53  ;;  %v2228_v20 = vand.u32 2147483647, %v2169_v53  ;;  %v2230_v21 = vand.u32 2147483648, %v2169_v53  ;;  %vm2224_vm9 = vweird.f32 %v2169_v53 }
 0x235   : > { %v2207_v34 = vmul.f32 %v2679_v41, %v2206_v8  ;;  %2684 = vpow2.f32 %v2158_v54  ;;  %v1958_v3 = vadd.f32 %v1946_v0, %v1872_v63  ;;  %v2147_v37 = vsub.f32 0.0, %v2139_v2 }
 0x236   : > { %vm2229_vm11 = vcmp.eq.f32.partialorder %v2228_v20, 8.507059e+37 }
 0x237   : > { %v2208_v5 = vadd.f32 %v2679_v41, %v2207_v34  ;;  %v2049_v6 = vadd.f32 %v2037_v4, %v1958_v3  ;;  %v2160_v31 = vmul.f32 1.442695, %v2147_v37 }
 0x239   : > { %v2212_v40 = vsel %vm2211_vm1, %v2679_v41, %v2208_v5  ;;  %v2132_v9 = vadd.f32 %v2120_v10, %v2049_v6  ;;  %2686 = vpow2.f32 %v2160_v31 }
 0x23a   : > { %v2683_v51 = vpop.eup %2682  ;;  %v2217_v55 = vsel %vm2214_vm8, %v2216_v32, %v2212_v40  ;;  %v1874_v12 = vpop.f32.mrf.mxu3 }
 0x23b   : > { %v2685_v59 = vpop.eup %2684  ;;  %2542 = vst.msk [vmem:[%s3262_s30 + $0xd0] sm:$0xff] %vm850_vm4, %v2217_v55  ;;  %v2220_v14 = vmul.f32 %v2683_v51, %v2169_v53  ;;  %v2140_v13 = vadd.f32 %v3427_v35, %v2132_v9  ;;  %v1875_v18 = vadd.f32 %v1874_v12, %v3439_v61  ;;  %vm2225_vm0 = vweird.f32 %v2683_v51 }
 0x23c   : > { %v2170_v16 = vadd.f32 1.0, %v2685_v59  ;;  %vm2226_vm10 = vmor %vm2224_vm9, %vm2225_vm0  ;;  %v2231_v61 = vor.u32 1.1754944e-38, %v2230_v21 }
 0x23d   : > { %v2221_v29 = vsub.f32 1.0, %v2220_v14  ;;  %v2148_v19 = vsub.f32 0.0, %v2140_v13  ;;  %v1959_v24 = vadd.f32 %v1949_v57, %v1875_v18 }
 0x23e   : > { %2688 = vrcp.f32 %v2170_v16  ;;  %v2245_v43 = vand.u32 2147483648, %v2170_v16  ;;  %v2243_v50 = vand.u32 2147483647, %v2170_v16  ;;  %vm2239_vm13 = vweird.f32 %v2170_v16 }
 0x23f   : > { %v2222_v23 = vmul.f32 %v2683_v51, %v2221_v29  ;;  %v2162_v17 = vmul.f32 1.442695, %v2148_v19  ;;  %v2687_v25 = vpop.eup %2686  ;;  %v2050_v27 = vadd.f32 %v2040_v56, %v1959_v24 }
 0x240   : > { %v2171_v30 = vadd.f32 1.0, %v2687_v25  ;;  %v2246_v15 = vor.u32 1.1754944e-38, %v2245_v43  ;;  %vm2244_vm15 = vcmp.eq.f32.partialorder %v2243_v50, 8.507059e+37 }
 0x241   : > { %v2223_v44 = vadd.f32 %v2683_v51, %v2222_v23  ;;  %2690 = vpow2.f32 %v2162_v17  ;;  %v2133_v36 = vadd.f32 %v2123_v28, %v2050_v27 }
 0x242   : > { %2692 = vrcp.f32 %v2171_v30  ;;  %v2260_v52 = vand.u32 2147483648, %v2171_v30  ;;  %v2258_v58 = vand.u32 2147483647, %v2171_v30  ;;  %vm2254_vm3 = vweird.f32 %v2171_v30 }
 0x243   : > { %v2227_v11 = vsel %vm2226_vm10, %v2683_v51, %v2223_v44  ;;  %v2141_v22 = vadd.f32 %v3427_v35, %v2133_v36 }
 0x244   : > { %v2689_v60 = vpop.eup %2688  ;;  %v2232_v33 = vsel %vm2229_vm11, %v2231_v61, %v2227_v11  ;;  %v2261_v26 = vor.u32 1.1754944e-38, %v2260_v52  ;;  %vm2259_vm6 = vcmp.eq.f32.partialorder %v2258_v58, 8.507059e+37 }
 0x245   : > { %2543 = vst.msk [vmem:[%s3262_s30 + $0xd8] sm:$0xff] %vm850_vm4, %v2232_v33  ;;  %v2235_v49 = vmul.f32 %v2689_v60, %v2170_v16  ;;  %v2149_v42 = vsub.f32 0.0, %v2141_v22  ;;  %vm2240_vm12 = vweird.f32 %v2689_v60 }
 0x246   : > { %vm2241_vm14 = vmor %vm2239_vm13, %vm2240_vm12 }
 0x247   : > { %v2691_v38 = vpop.eup %2690  ;;  %v2236_v39 = vsub.f32 1.0, %v2235_v49  ;;  %v2164_v47 = vmul.f32 1.442695, %v2149_v42 }
 0x248   : > { %v2172_v41 = vadd.f32 1.0, %v2691_v38  ;;  %v2693_v48 = vpop.eup %2692 }
 0x249   : > { %v2237_v45 = vmul.f32 %v2689_v60, %v2236_v39  ;;  %v2250_v62 = vmul.f32 %v2693_v48, %v2171_v30  ;;  %vm2255_vm2 = vweird.f32 %v2693_v48 }
 0x24a   : > { %2694 = vrcp.f32 %v2172_v41  ;;  %vm2256_vm5 = vmor %vm2254_vm3, %vm2255_vm2  ;;  %v2275_v5 = vand.u32 2147483648, %v2172_v41  ;;  %v2273_v6 = vand.u32 2147483647, %v2172_v41  ;;  %vm2269_vm1 = vweird.f32 %v2172_v41 }
 0x24b   : > { %v2238_v7 = vadd.f32 %v2689_v60, %v2237_v45  ;;  %2696 = vpow2.f32 %v2164_v47  ;;  %v2251_v35 = vsub.f32 1.0, %v2250_v62 }
 0x24c   : > { %v2276_v32 = vor.u32 1.1754944e-38, %v2275_v5  ;;  %vm2274_vm0 = vcmp.eq.f32.partialorder %v2273_v6, 8.507059e+37 }
 0x24d   : > { %v2242_v53 = vsel %vm2241_vm14, %v2689_v60, %v2238_v7  ;;  %v2252_v46 = vmul.f32 %v2693_v48, %v2251_v35 }
 0x24e   : > { %v2247_v54 = vsel %vm2244_vm15, %v2246_v15, %v2242_v53 }
 0x24f   : > { %2544 = vst.msk [vmem:[%s3262_s30 + $0xe0] sm:$0xff] %vm850_vm4, %v2247_v54  ;;  %v2253_v0 = vadd.f32 %v2693_v48, %v2252_v46 }
 0x250   : > { %v2695_v8 = vpop.eup %2694 }
 0x251   : > { %v2697_v63 = vpop.eup %2696  ;;  %v2265_v1 = vmul.f32 %v2695_v8, %v2172_v41  ;;  %v2257_v2 = vsel %vm2256_vm5, %v2693_v48, %v2253_v0  ;;  %vm2270_vm7 = vweird.f32 %v2695_v8 }
 0x252   : > { %v2173_v34 = vadd.f32 1.0, %v2697_v63  ;;  %v2262_v4 = vsel %vm2259_vm6, %v2261_v26, %v2257_v2  ;;  %vm2271_vm8 = vmor %vm2269_vm1, %vm2270_vm7 }
 0x253   : > { %v2266_v3 = vsub.f32 1.0, %v2265_v1  ;;  %2545 = vst.msk [vmem:[%s3262_s30 + $0xe8] sm:$0xff] %vm850_vm4, %v2262_v4 }
 0x254   : > { %2698 = vrcp.f32 %v2173_v34  ;;  %v2290_v12 = vand.u32 2147483648, %v2173_v34  ;;  %v2288_v14 = vand.u32 2147483647, %v2173_v34  ;;  %vm2284_vm10 = vweird.f32 %v2173_v34 }
 0x255   : > { %v2267_v37 = vmul.f32 %v2695_v8, %v2266_v3 }
 0x256   : > { %v2291_v16 = vor.u32 1.1754944e-38, %v2290_v12  ;;  %vm2289_vm12 = vcmp.eq.f32.partialorder %v2288_v14, 8.507059e+37 }
 0x257   : > { %v2268_v10 = vadd.f32 %v2695_v8, %v2267_v37 }
 0x259   : > { %v2272_v40 = vsel %vm2271_vm8, %v2695_v8, %v2268_v10 }
 0x25a   : > { %v2699_v31 = vpop.eup %2698  ;;  %v2277_v9 = vsel %vm2274_vm0, %v2276_v32, %v2272_v40 }
 0x25b   : > { %2546 = vst.msk [vmem:[%s3262_s30 + $0xf0] sm:$0xff] %vm850_vm4, %v2277_v9  ;;  %v2280_v51 = vmul.f32 %v2699_v31, %v2173_v34  ;;  %vm2285_vm9 = vweird.f32 %v2699_v31 }
 0x25c   : > { %vm2286_vm11 = vmor %vm2284_vm10, %vm2285_vm9 }
 0x25d   : > { %v2281_v55 = vsub.f32 1.0, %v2280_v51 }
 0x25f   : > { %v2282_v59 = vmul.f32 %v2699_v31, %v2281_v55 }
 0x261   : > { %v2283_v13 = vadd.f32 %v2699_v31, %v2282_v59 }
 0x263   : > { %v2287_v18 = vsel %vm2286_vm11, %v2699_v31, %v2283_v13 }
 0x264   : > { %v2292_v57 = vsel %vm2289_vm12, %v2291_v16, %v2287_v18 }
 0x265   : > { %2547 = vst.msk [vmem:[%s3262_s30 + $0xf8] sm:$0xff] %vm850_vm4, %v2292_v57 }
 0x266 PF: > { %s17_s24 = sadd.s32 1, %s2707_s24  }
 0x267   : > { %p14_p4 = scmp.ge.s32.totalorder %s17_s24, 4  }
 0x269   :  { %16 = sbr.rel (!%p14_p4) target bundleno = 1 (0x1), region = 95 }

</bundles_post_ra>
